<compile_context>
chip_gen: v5e
topology: v5e:2x2
jax: 0.10.0
libtpu: 0.0.40
codegen_flags: <defaults>
</compile_context>

<pallas_src>
import functools
import math

import jax
import jax.numpy as jnp
from jax.experimental import pallas as pl
from jax.experimental.pallas import tpu as pltpu


def _ru(x, m):
    return (x + m - 1) // m * m


def _conv_kernel(x_ref, w_ref, b_ref, o_ref, acc_ref, *, bn, cin, ksize, stride,
                 oh, ow):
    """One grid step: shifted-tap GEMMs for `bn` images.

    x_ref  : (bn, s*s, Hq, Wq, Cin)   phase-split padded input slab (VMEM)
    w_ref  : (kH*kW, Cin, Cout_pad)   per-tap weight matrices (resident)
    b_ref  : (1, Cout_pad)            bias row (f32)
    o_ref  : (bn, oH*oW, Cout_pad)    lane-dense output block
    acc_ref: (oH*oW, Cout_pad) f32    accumulator scratch
    """
    kH, kW = ksize
    s = stride
    m = oh * ow
    for n in range(bn):                      # static unroll, bn is small
        acc_ref[...] = jnp.zeros_like(acc_ref)
        for t in range(kH * kW):             # static unroll over kernel taps
            r, c = divmod(t, kW)
            ph, qh = r % s, r // s           # phase / in-phase offset of tap row
            pw, qw = c % s, c // s           # phase / in-phase offset of tap col
            # Contiguous (oH, oW, Cin) window of the right phase plane.
            slab = x_ref[n, ph * s + pw, qh:qh + oh, qw:qw + ow, :]
            # Merge leading dims; lane dim (Cin) is unchanged -> cheap reshape.
            slab = slab.reshape(m, cin)
            acc_ref[...] += jnp.dot(slab, w_ref[t],
                                    preferred_element_type=jnp.float32)
        o_ref[n] = (acc_ref[...] + b_ref[...]).astype(o_ref.dtype)


def _vmem_budget():
    """Return (block budget, scoped VMEM limit) in bytes, generation aware."""
    cap = 64 * 1024 * 1024  # v7x per-core VMEM = smallest of v5e/v6e/v7x
    try:
        cap = int(getattr(pltpu.get_tpu_info(), "vmem_capacity_bytes", cap))
    except Exception:
        pass
    budget = max(8 << 20, cap // 2 - (8 << 20))          # blocks + double buffers
    limit = min(cap - (8 << 20), budget + (16 << 20))    # scoped limit w/ headroom
    return budget, limit


def conv2d_pallas(x, weight, bias=None, *, stride=1, padding=0,
                  mxu_bf16=False, out_layout="NCHW"):
    """2D convolution (NCHW input, OIHW weight) with in-kernel patch extraction."""
    N, Cin, H, W = x.shape
    Cout, Cin_w, kH, kW = weight.shape
    assert Cin == Cin_w, (Cin, Cin_w)
    if isinstance(padding, int):
        padding = (padding, padding)
    pH, pW = padding
    s = int(stride)

    oH = (H + 2 * pH - kH) // s + 1
    oW = (W + 2 * pW - kW) // s + 1
    assert oH > 0 and oW > 0, (oH, oW)

    out_dtype = x.dtype if jnp.issubdtype(x.dtype, jnp.floating) else jnp.float32
    stream_dtype = jnp.bfloat16 if mxu_bf16 else jnp.float32

    # --- input: pad once; phase-split (space-to-depth) once when stride>1 ----
    Hp, Wp = H + 2 * pH, W + 2 * pW
    x_pad = jnp.pad(x.astype(stream_dtype), ((0, 0), (0, 0), (pH, pH), (pW, pW)))
    if s == 1:
        Hq, Wq = Hp, Wp
        x_sd = x_pad.transpose(0, 2, 3, 1)[:, None]             # (N,1,Hp,Wp,Cin)
    else:
        Hq, Wq = -(-Hp // s), -(-Wp // s)
        x_pp = jnp.pad(x_pad,
                       ((0, 0), (0, 0), (0, Hq * s - Hp), (0, Wq * s - Wp)))
        x_sd = (x_pp.reshape(N, Cin, Hq, s, Wq, s)
                .transpose(0, 3, 5, 2, 4, 1)                    # (N,ph,pw,Hq,Wq,Cin)
                .reshape(N, s * s, Hq, Wq, Cin))

    # --- weights / bias: per-tap (Cin, Cout) matrices, Cout padded to 128 ----
    Cout_pad = _ru(Cout, 128)   # lane-dense output stores + full MXU N dim
    w_all = (weight.astype(stream_dtype)
             .transpose(2, 3, 1, 0)                              # (kH,kW,Cin,Cout)
             .reshape(kH * kW, Cin, Cout))
    w_all = jnp.pad(w_all, ((0, 0), (0, 0), (0, Cout_pad - Cout)))
    if bias is None:
        b_row = jnp.zeros((1, Cout_pad), jnp.float32)
    else:
        b_row = jnp.pad(bias.astype(jnp.float32).reshape(1, Cout),
                        ((0, 0), (0, Cout_pad - Cout)))

    # --- choose images per grid step from a VMEM budget ----------------------
    itemsize = jnp.dtype(stream_dtype).itemsize
    m = oH * oW
    in_blk = s * s * Hq * _ru(Wq, 8) * _ru(Cin, 128) * itemsize          # 1 buf / img
    out_blk = _ru(m, 8) * Cout_pad * jnp.dtype(out_dtype).itemsize       # 1 buf / img
    w_bytes = kH * kW * _ru(Cin, 8) * Cout_pad * itemsize
    fixed = 2 * w_bytes + _ru(m, 8) * Cout_pad * 4 + 8 * Cout_pad        # weights(x2)+acc+bias
    per_img = 2 * (in_blk + out_blk)                                     # double-buffered
    budget, vmem_limit = _vmem_budget()

    min_steps = min(N, 8)   # keep several grid steps for megacore / pipelining
    bn = 1
    for cand in range(1, N + 1):
        if N % cand:
            continue
        if N // cand < min_steps:
            break
        if fixed + cand * per_img <= budget:
            bn = cand
    # TODO(synk): for very large images a single-image block can exceed the
    # VMEM budget; output-row (spatial) tiling would be needed in that case.

    grid = (N // bn,)
    kernel = functools.partial(_conv_kernel, bn=bn, cin=Cin, ksize=(kH, kW),
                               stride=s, oh=oH, ow=oW)

    out_p = pl.pallas_call(
        kernel,
        out_shape=jax.ShapeDtypeStruct((N, m, Cout_pad), out_dtype),
        grid_spec=pltpu.PrefetchScalarGridSpec(
            num_scalar_prefetch=0,
            grid=grid,
            in_specs=[
                # Phase-split padded input for `bn` images (streamed once).
                pl.BlockSpec((bn, s * s, Hq, Wq, Cin),
                             lambda i: (i, 0, 0, 0, 0)),
                # Weight / bias: constant index maps -> fetched once, resident.
                pl.BlockSpec((kH * kW, Cin, Cout_pad), lambda i: (0, 0, 0)),
                pl.BlockSpec((1, Cout_pad), lambda i: (0, 0)),
            ],
            out_specs=pl.BlockSpec((bn, m, Cout_pad), lambda i: (i, 0, 0)),
            scratch_shapes=[pltpu.VMEM((m, Cout_pad), jnp.float32)],
        ),
        compiler_params=pltpu.CompilerParams(
            dimension_semantics=("parallel",),
            vmem_limit_bytes=int(vmem_limit),
        ),
    )(x_sd, w_all, b_row)

    out_nhwc = out_p[:, :, :Cout].reshape(N, oH, oW, Cout)
    if out_layout == "NHWC":
        return out_nhwc
    # NOTE: this NHWC->NCHW transpose is one extra full HBM pass over the
    # output; pass out_layout="NHWC" to skip it when the consumer allows.
    return out_nhwc.transpose(0, 3, 1, 2)


# TODO(synk): backward()/param()/zero_grad() training plumbing of the PyTorch
# module is not implemented; only the forward pass is translated.


if __name__ == "__main__":
    key = jax.random.PRNGKey(0)
    k_x, k_w, k_b = jax.random.split(key, 3)

    # Small shapes consistent with the module's usage (conv-net activations).
    N, Cin, H, W = 2, 4, 16, 16
    Cout, kH, kW = 8, 3, 3

    x = jax.random.normal(k_x, (N, Cin, H, W), dtype=jnp.float32)
    fan_in = Cin * kH * kW
    Kinit = math.sqrt(1.0 / fan_in)         # matches the module's 'uniform' init
    weight = jax.random.uniform(k_w, (Cout, Cin, kH, kW), jnp.float32,
                                -Kinit, Kinit)
    bias = jax.random.uniform(k_b, (Cout,), jnp.float32, -Kinit, Kinit)

    def ref_conv(xv, wv, bv, st, pd):
        out = jax.lax.conv_general_dilated(
            xv, wv, window_strides=(st, st),
            padding=((pd[0], pd[0]), (pd[1], pd[1])),
            dimension_numbers=("NCHW", "OIHW", "NCHW"))
        if bv is not None:
            out = out + bv.reshape(1, -1, 1, 1)
        return out

    # stride 1, padding 1, with bias
    y = conv2d_pallas(x, weight, bias, stride=1, padding=(1, 1))
    jax.block_until_ready(y)
    y_ref = ref_conv(x, weight, bias, 1, (1, 1))
    assert y.shape == y_ref.shape, (y.shape, y_ref.shape)
    assert jnp.allclose(y, y_ref, atol=1e-4, rtol=1e-4), float(
        jnp.max(jnp.abs(y - y_ref)))

    # stride 2, no bias (exercises the phase-split path)
    y2 = conv2d_pallas(x, weight, None, stride=2, padding=(1, 1))
    jax.block_until_ready(y2)
    y2_ref = ref_conv(x, weight, None, 2, (1, 1))
    assert y2.shape == y2_ref.shape, (y2.shape, y2_ref.shape)
    assert jnp.allclose(y2, y2_ref, atol=1e-4, rtol=1e-4), float(
        jnp.max(jnp.abs(y2 - y2_ref)))

    # optional bf16-streamed path (halves HBM bytes on the A stream; f32 accum)
    y3 = conv2d_pallas(x, weight, bias, stride=1, padding=(1, 1), mxu_bf16=True)
    jax.block_until_ready(y3)
    assert jnp.allclose(y3, y_ref, atol=2e-2, rtol=2e-2), float(
        jnp.max(jnp.abs(y3 - y_ref)))

    print("KERNEL_OK")
</pallas_src>

<mosaic_0001>
module attributes {stable_mosaic.version = 11 : i64} {
  func.func @_conv_kernel(%arg0: i32, %arg1: memref<1x1x18x18x4xf32, #tpu.memory_space<vmem>>, %arg2: memref<9x4x128xf32, #tpu.memory_space<vmem>>, %arg3: memref<1x128xf32, #tpu.memory_space<vmem>>, %arg4: memref<1x256x128xf32, #tpu.memory_space<vmem>>, %arg5: memref<256x128xf32, #tpu.memory_space<vmem>>) attributes {dimension_semantics = [#tpu.dimension_semantics<parallel>], iteration_bounds = array<i64: 2>, scalar_prefetch = 0 : i64, scratch_operands = 1 : i64, tpu.core_type = #tpu.core_type<tc>, window_params = [{transform_indices = @transform_0, window_bounds = array<i64: 1, 1, 18, 18, 4>}, {pipeline_mode = #tpu.pipeline_mode<synchronous>, transform_indices = @transform_1, window_bounds = array<i64: 9, 4, 128>}, {pipeline_mode = #tpu.pipeline_mode<synchronous>, transform_indices = @transform_2, window_bounds = array<i64: 1, 128>}, {transform_indices = @transform_3, window_bounds = array<i64: 1, 256, 128>}]} {
    %cst = arith.constant 0.000000e+00 : f32
    %0 = vector.broadcast %cst : f32 to vector<256x128xf32>
    %c0 = arith.constant 0 : index
    %c0_0 = arith.constant 0 : index
    %1 = vector.load %arg5[%c0, %c0_0] : memref<256x128xf32, #tpu.memory_space<vmem>>, vector<256x128xf32>
    tpu.vector_store %arg5[%c0, %c0_0], %0 {strides = array<i32>} : memref<256x128xf32, #tpu.memory_space<vmem>>, vector<256x128xf32>,
    %c0_1 = arith.constant 0 : index
    %c0_2 = arith.constant 0 : index
    %c0_3 = arith.constant 0 : index
    %c0_4 = arith.constant 0 : index
    %c0_5 = arith.constant 0 : index
    %2 = vector.load %arg1[%c0_1, %c0_2, %c0_3, %c0_4, %c0_5] : memref<1x1x18x18x4xf32, #tpu.memory_space<vmem>>, vector<1x1x16x16x4xf32>
    %3 = vector.shape_cast %2 : vector<1x1x16x16x4xf32> to vector<16x16x4xf32>
    %4 = vector.shape_cast %3 : vector<16x16x4xf32> to vector<256x4xf32>
    %c0_6 = arith.constant 0 : index
    %c0_7 = arith.constant 0 : index
    %5 = vector.load %arg5[%c0_6, %c0_7] : memref<256x128xf32, #tpu.memory_space<vmem>>, vector<256x128xf32>
    %c0_8 = arith.constant 0 : index
    %c0_9 = arith.constant 0 : index
    %c0_10 = arith.constant 0 : index
    %6 = vector.load %arg2[%c0_8, %c0_9, %c0_10] : memref<9x4x128xf32, #tpu.memory_space<vmem>>, vector<1x4x128xf32>
    %7 = vector.shape_cast %6 : vector<1x4x128xf32> to vector<4x128xf32>
    %cst_11 = arith.constant dense<0.000000e+00> : vector<256x128xf32>
    %8 = tpu.matmul %4, %7, %cst_11 {dimension_numbers = #tpu.dot_dimension_numbers<[1], [0], [0], [1], [0, 0, 1, 1], [], []>} : vector<256x4xf32>, vector<4x128xf32>, vector<256x128xf32> -> vector<256x128xf32>
    %9 = arith.addf %5, %8 : vector<256x128xf32>
    %c0_12 = arith.constant 0 : index
    %c0_13 = arith.constant 0 : index
    %10 = vector.load %arg5[%c0_12, %c0_13] : memref<256x128xf32, #tpu.memory_space<vmem>>, vector<256x128xf32>
    tpu.vector_store %arg5[%c0_12, %c0_13], %9 {strides = array<i32>} : memref<256x128xf32, #tpu.memory_space<vmem>>, vector<256x128xf32>,
    %c0_14 = arith.constant 0 : index
    %c0_15 = arith.constant 0 : index
    %c0_16 = arith.constant 0 : index
    %c1 = arith.constant 1 : index
    %c0_17 = arith.constant 0 : index
    %11 = vector.load %arg1[%c0_14, %c0_15, %c0_16, %c1, %c0_17] : memref<1x1x18x18x4xf32, #tpu.memory_space<vmem>>, vector<1x1x16x16x4xf32>
    %12 = vector.shape_cast %11 : vector<1x1x16x16x4xf32> to vector<16x16x4xf32>
    %13 = vector.shape_cast %12 : vector<16x16x4xf32> to vector<256x4xf32>
    %c0_18 = arith.constant 0 : index
    %c0_19 = arith.constant 0 : index
    %14 = vector.load %arg5[%c0_18, %c0_19] : memref<256x128xf32, #tpu.memory_space<vmem>>, vector<256x128xf32>
    %c1_20 = arith.constant 1 : index
    %c0_21 = arith.constant 0 : index
    %c0_22 = arith.constant 0 : index
    %15 = vector.load %arg2[%c1_20, %c0_21, %c0_22] : memref<9x4x128xf32, #tpu.memory_space<vmem>>, vector<1x4x128xf32>
    %16 = vector.shape_cast %15 : vector<1x4x128xf32> to vector<4x128xf32>
    %cst_23 = arith.constant dense<0.000000e+00> : vector<256x128xf32>
    %17 = tpu.matmul %13, %16, %cst_23 {dimension_numbers = #tpu.dot_dimension_numbers<[1], [0], [0], [1], [0, 0, 1, 1], [], []>} : vector<256x4xf32>, vector<4x128xf32>, vector<256x128xf32> -> vector<256x128xf32>
    %18 = arith.addf %14, %17 : vector<256x128xf32>
    %c0_24 = arith.constant 0 : index
    %c0_25 = arith.constant 0 : index
    %19 = vector.load %arg5[%c0_24, %c0_25] : memref<256x128xf32, #tpu.memory_space<vmem>>, vector<256x128xf32>
    tpu.vector_store %arg5[%c0_24, %c0_25], %18 {strides = array<i32>} : memref<256x128xf32, #tpu.memory_space<vmem>>, vector<256x128xf32>,
    %c0_26 = arith.constant 0 : index
    %c0_27 = arith.constant 0 : index
    %c0_28 = arith.constant 0 : index
    %c2 = arith.constant 2 : index
    %c0_29 = arith.constant 0 : index
    %20 = vector.load %arg1[%c0_26, %c0_27, %c0_28, %c2, %c0_29] : memref<1x1x18x18x4xf32, #tpu.memory_space<vmem>>, vector<1x1x16x16x4xf32>
    %21 = vector.shape_cast %20 : vector<1x1x16x16x4xf32> to vector<16x16x4xf32>
    %22 = vector.shape_cast %21 : vector<16x16x4xf32> to vector<256x4xf32>
    %c0_30 = arith.constant 0 : index
    %c0_31 = arith.constant 0 : index
    %23 = vector.load %arg5[%c0_30, %c0_31] : memref<256x128xf32, #tpu.memory_space<vmem>>, vector<256x128xf32>
    %c2_32 = arith.constant 2 : index
    %c0_33 = arith.constant 0 : index
    %c0_34 = arith.constant 0 : index
    %24 = vector.load %arg2[%c2_32, %c0_33, %c0_34] : memref<9x4x128xf32, #tpu.memory_space<vmem>>, vector<1x4x128xf32>
    %25 = vector.shape_cast %24 : vector<1x4x128xf32> to vector<4x128xf32>
    %cst_35 = arith.constant dense<0.000000e+00> : vector<256x128xf32>
    %26 = tpu.matmul %22, %25, %cst_35 {dimension_numbers = #tpu.dot_dimension_numbers<[1], [0], [0], [1], [0, 0, 1, 1], [], []>} : vector<256x4xf32>, vector<4x128xf32>, vector<256x128xf32> -> vector<256x128xf32>
    %27 = arith.addf %23, %26 : vector<256x128xf32>
    %c0_36 = arith.constant 0 : index
    %c0_37 = arith.constant 0 : index
    %28 = vector.load %arg5[%c0_36, %c0_37] : memref<256x128xf32, #tpu.memory_space<vmem>>, vector<256x128xf32>
    tpu.vector_store %arg5[%c0_36, %c0_37], %27 {strides = array<i32>} : memref<256x128xf32, #tpu.memory_space<vmem>>, vector<256x128xf32>,
    %c0_38 = arith.constant 0 : index
    %c0_39 = arith.constant 0 : index
    %c1_40 = arith.constant 1 : index
    %c0_41 = arith.constant 0 : index
    %c0_42 = arith.constant 0 : index
    %29 = vector.load %arg1[%c0_38, %c0_39, %c1_40, %c0_41, %c0_42] : memref<1x1x18x18x4xf32, #tpu.memory_space<vmem>>, vector<1x1x16x16x4xf32>
    %30 = vector.shape_cast %29 : vector<1x1x16x16x4xf32> to vector<16x16x4xf32>
    %31 = vector.shape_cast %30 : vector<16x16x4xf32> to vector<256x4xf32>
    %c0_43 = arith.constant 0 : index
    %c0_44 = arith.constant 0 : index
    %32 = vector.load %arg5[%c0_43, %c0_44] : memref<256x128xf32, #tpu.memory_space<vmem>>, vector<256x128xf32>
    %c3 = arith.constant 3 : index
    %c0_45 = arith.constant 0 : index
    %c0_46 = arith.constant 0 : index
    %33 = vector.load %arg2[%c3, %c0_45, %c0_46] : memref<9x4x128xf32, #tpu.memory_space<vmem>>, vector<1x4x128xf32>
    %34 = vector.shape_cast %33 : vector<1x4x128xf32> to vector<4x128xf32>
    %cst_47 = arith.constant dense<0.000000e+00> : vector<256x128xf32>
    %35 = tpu.matmul %31, %34, %cst_47 {dimension_numbers = #tpu.dot_dimension_numbers<[1], [0], [0], [1], [0, 0, 1, 1], [], []>} : vector<256x4xf32>, vector<4x128xf32>, vector<256x128xf32> -> vector<256x128xf32>
    %36 = arith.addf %32, %35 : vector<256x128xf32>
    %c0_48 = arith.constant 0 : index
    %c0_49 = arith.constant 0 : index
    %37 = vector.load %arg5[%c0_48, %c0_49] : memref<256x128xf32, #tpu.memory_space<vmem>>, vector<256x128xf32>
    tpu.vector_store %arg5[%c0_48, %c0_49], %36 {strides = array<i32>} : memref<256x128xf32, #tpu.memory_space<vmem>>, vector<256x128xf32>,
    %c0_50 = arith.constant 0 : index
    %c0_51 = arith.constant 0 : index
    %c1_52 = arith.constant 1 : index
    %c1_53 = arith.constant 1 : index
    %c0_54 = arith.constant 0 : index
    %38 = vector.load %arg1[%c0_50, %c0_51, %c1_52, %c1_53, %c0_54] : memref<1x1x18x18x4xf32, #tpu.memory_space<vmem>>, vector<1x1x16x16x4xf32>
    %39 = vector.shape_cast %38 : vector<1x1x16x16x4xf32> to vector<16x16x4xf32>
    %40 = vector.shape_cast %39 : vector<16x16x4xf32> to vector<256x4xf32>
    %c0_55 = arith.constant 0 : index
    %c0_56 = arith.constant 0 : index
    %41 = vector.load %arg5[%c0_55, %c0_56] : memref<256x128xf32, #tpu.memory_space<vmem>>, vector<256x128xf32>
    %c4 = arith.constant 4 : index
    %c0_57 = arith.constant 0 : index
    %c0_58 = arith.constant 0 : index
    %42 = vector.load %arg2[%c4, %c0_57, %c0_58] : memref<9x4x128xf32, #tpu.memory_space<vmem>>, vector<1x4x128xf32>
    %43 = vector.shape_cast %42 : vector<1x4x128xf32> to vector<4x128xf32>
    %cst_59 = arith.constant dense<0.000000e+00> : vector<256x128xf32>
    %44 = tpu.matmul %40, %43, %cst_59 {dimension_numbers = #tpu.dot_dimension_numbers<[1], [0], [0], [1], [0, 0, 1, 1], [], []>} : vector<256x4xf32>, vector<4x128xf32>, vector<256x128xf32> -> vector<256x128xf32>
    %45 = arith.addf %41, %44 : vector<256x128xf32>
    %c0_60 = arith.constant 0 : index
    %c0_61 = arith.constant 0 : index
    %46 = vector.load %arg5[%c0_60, %c0_61] : memref<256x128xf32, #tpu.memory_space<vmem>>, vector<256x128xf32>
    tpu.vector_store %arg5[%c0_60, %c0_61], %45 {strides = array<i32>} : memref<256x128xf32, #tpu.memory_space<vmem>>, vector<256x128xf32>,
    %c0_62 = arith.constant 0 : index
    %c0_63 = arith.constant 0 : index
    %c1_64 = arith.constant 1 : index
    %c2_65 = arith.constant 2 : index
    %c0_66 = arith.constant 0 : index
    %47 = vector.load %arg1[%c0_62, %c0_63, %c1_64, %c2_65, %c0_66] : memref<1x1x18x18x4xf32, #tpu.memory_space<vmem>>, vector<1x1x16x16x4xf32>
    %48 = vector.shape_cast %47 : vector<1x1x16x16x4xf32> to vector<16x16x4xf32>
    %49 = vector.shape_cast %48 : vector<16x16x4xf32> to vector<256x4xf32>
    %c0_67 = arith.constant 0 : index
    %c0_68 = arith.constant 0 : index
    %50 = vector.load %arg5[%c0_67, %c0_68] : memref<256x128xf32, #tpu.memory_space<vmem>>, vector<256x128xf32>
    %c5 = arith.constant 5 : index
    %c0_69 = arith.constant 0 : index
    %c0_70 = arith.constant 0 : index
    %51 = vector.load %arg2[%c5, %c0_69, %c0_70] : memref<9x4x128xf32, #tpu.memory_space<vmem>>, vector<1x4x128xf32>
    %52 = vector.shape_cast %51 : vector<1x4x128xf32> to vector<4x128xf32>
    %cst_71 = arith.constant dense<0.000000e+00> : vector<256x128xf32>
    %53 = tpu.matmul %49, %52, %cst_71 {dimension_numbers = #tpu.dot_dimension_numbers<[1], [0], [0], [1], [0, 0, 1, 1], [], []>} : vector<256x4xf32>, vector<4x128xf32>, vector<256x128xf32> -> vector<256x128xf32>
    %54 = arith.addf %50, %53 : vector<256x128xf32>
    %c0_72 = arith.constant 0 : index
    %c0_73 = arith.constant 0 : index
    %55 = vector.load %arg5[%c0_72, %c0_73] : memref<256x128xf32, #tpu.memory_space<vmem>>, vector<256x128xf32>
    tpu.vector_store %arg5[%c0_72, %c0_73], %54 {strides = array<i32>} : memref<256x128xf32, #tpu.memory_space<vmem>>, vector<256x128xf32>,
    %c0_74 = arith.constant 0 : index
    %c0_75 = arith.constant 0 : index
    %c2_76 = arith.constant 2 : index
    %c0_77 = arith.constant 0 : index
    %c0_78 = arith.constant 0 : index
    %56 = vector.load %arg1[%c0_74, %c0_75, %c2_76, %c0_77, %c0_78] : memref<1x1x18x18x4xf32, #tpu.memory_space<vmem>>, vector<1x1x16x16x4xf32>
    %57 = vector.shape_cast %56 : vector<1x1x16x16x4xf32> to vector<16x16x4xf32>
    %58 = vector.shape_cast %57 : vector<16x16x4xf32> to vector<256x4xf32>
    %c0_79 = arith.constant 0 : index
    %c0_80 = arith.constant 0 : index
    %59 = vector.load %arg5[%c0_79, %c0_80] : memref<256x128xf32, #tpu.memory_space<vmem>>, vector<256x128xf32>
    %c6 = arith.constant 6 : index
    %c0_81 = arith.constant 0 : index
    %c0_82 = arith.constant 0 : index
    %60 = vector.load %arg2[%c6, %c0_81, %c0_82] : memref<9x4x128xf32, #tpu.memory_space<vmem>>, vector<1x4x128xf32>
    %61 = vector.shape_cast %60 : vector<1x4x128xf32> to vector<4x128xf32>
    %cst_83 = arith.constant dense<0.000000e+00> : vector<256x128xf32>
    %62 = tpu.matmul %58, %61, %cst_83 {dimension_numbers = #tpu.dot_dimension_numbers<[1], [0], [0], [1], [0, 0, 1, 1], [], []>} : vector<256x4xf32>, vector<4x128xf32>, vector<256x128xf32> -> vector<256x128xf32>
    %63 = arith.addf %59, %62 : vector<256x128xf32>
    %c0_84 = arith.constant 0 : index
    %c0_85 = arith.constant 0 : index
    %64 = vector.load %arg5[%c0_84, %c0_85] : memref<256x128xf32, #tpu.memory_space<vmem>>, vector<256x128xf32>
    tpu.vector_store %arg5[%c0_84, %c0_85], %63 {strides = array<i32>} : memref<256x128xf32, #tpu.memory_space<vmem>>, vector<256x128xf32>,
    %c0_86 = arith.constant 0 : index
    %c0_87 = arith.constant 0 : index
    %c2_88 = arith.constant 2 : index
    %c1_89 = arith.constant 1 : index
    %c0_90 = arith.constant 0 : index
    %65 = vector.load %arg1[%c0_86, %c0_87, %c2_88, %c1_89, %c0_90] : memref<1x1x18x18x4xf32, #tpu.memory_space<vmem>>, vector<1x1x16x16x4xf32>
    %66 = vector.shape_cast %65 : vector<1x1x16x16x4xf32> to vector<16x16x4xf32>
    %67 = vector.shape_cast %66 : vector<16x16x4xf32> to vector<256x4xf32>
    %c0_91 = arith.constant 0 : index
    %c0_92 = arith.constant 0 : index
    %68 = vector.load %arg5[%c0_91, %c0_92] : memref<256x128xf32, #tpu.memory_space<vmem>>, vector<256x128xf32>
    %c7 = arith.constant 7 : index
    %c0_93 = arith.constant 0 : index
    %c0_94 = arith.constant 0 : index
    %69 = vector.load %arg2[%c7, %c0_93, %c0_94] : memref<9x4x128xf32, #tpu.memory_space<vmem>>, vector<1x4x128xf32>
    %70 = vector.shape_cast %69 : vector<1x4x128xf32> to vector<4x128xf32>
    %cst_95 = arith.constant dense<0.000000e+00> : vector<256x128xf32>
    %71 = tpu.matmul %67, %70, %cst_95 {dimension_numbers = #tpu.dot_dimension_numbers<[1], [0], [0], [1], [0, 0, 1, 1], [], []>} : vector<256x4xf32>, vector<4x128xf32>, vector<256x128xf32> -> vector<256x128xf32>
    %72 = arith.addf %68, %71 : vector<256x128xf32>
    %c0_96 = arith.constant 0 : index
    %c0_97 = arith.constant 0 : index
    %73 = vector.load %arg5[%c0_96, %c0_97] : memref<256x128xf32, #tpu.memory_space<vmem>>, vector<256x128xf32>
    tpu.vector_store %arg5[%c0_96, %c0_97], %72 {strides = array<i32>} : memref<256x128xf32, #tpu.memory_space<vmem>>, vector<256x128xf32>,
    %c0_98 = arith.constant 0 : index
    %c0_99 = arith.constant 0 : index
    %c2_100 = arith.constant 2 : index
    %c2_101 = arith.constant 2 : index
    %c0_102 = arith.constant 0 : index
    %74 = vector.load %arg1[%c0_98, %c0_99, %c2_100, %c2_101, %c0_102] : memref<1x1x18x18x4xf32, #tpu.memory_space<vmem>>, vector<1x1x16x16x4xf32>
    %75 = vector.shape_cast %74 : vector<1x1x16x16x4xf32> to vector<16x16x4xf32>
    %76 = vector.shape_cast %75 : vector<16x16x4xf32> to vector<256x4xf32>
    %c0_103 = arith.constant 0 : index
    %c0_104 = arith.constant 0 : index
    %77 = vector.load %arg5[%c0_103, %c0_104] : memref<256x128xf32, #tpu.memory_space<vmem>>, vector<256x128xf32>
    %c8 = arith.constant 8 : index
    %c0_105 = arith.constant 0 : index
    %c0_106 = arith.constant 0 : index
    %78 = vector.load %arg2[%c8, %c0_105, %c0_106] : memref<9x4x128xf32, #tpu.memory_space<vmem>>, vector<1x4x128xf32>
    %79 = vector.shape_cast %78 : vector<1x4x128xf32> to vector<4x128xf32>
    %cst_107 = arith.constant dense<0.000000e+00> : vector<256x128xf32>
    %80 = tpu.matmul %76, %79, %cst_107 {dimension_numbers = #tpu.dot_dimension_numbers<[1], [0], [0], [1], [0, 0, 1, 1], [], []>} : vector<256x4xf32>, vector<4x128xf32>, vector<256x128xf32> -> vector<256x128xf32>
    %81 = arith.addf %77, %80 : vector<256x128xf32>
    %c0_108 = arith.constant 0 : index
    %c0_109 = arith.constant 0 : index
    %82 = vector.load %arg5[%c0_108, %c0_109] : memref<256x128xf32, #tpu.memory_space<vmem>>, vector<256x128xf32>
    tpu.vector_store %arg5[%c0_108, %c0_109], %81 {strides = array<i32>} : memref<256x128xf32, #tpu.memory_space<vmem>>, vector<256x128xf32>,
    %c0_110 = arith.constant 0 : index
    %c0_111 = arith.constant 0 : index
    %83 = vector.load %arg5[%c0_110, %c0_111] : memref<256x128xf32, #tpu.memory_space<vmem>>, vector<256x128xf32>
    %c0_112 = arith.constant 0 : index
    %c0_113 = arith.constant 0 : index
    %84 = vector.load %arg3[%c0_112, %c0_113] : memref<1x128xf32, #tpu.memory_space<vmem>>, vector<1x128xf32>
    %85 = vector.broadcast %84 : vector<1x128xf32> to vector<256x128xf32>
    %86 = arith.addf %83, %85 : vector<256x128xf32>
    %c0_114 = arith.constant 0 : index
    %c0_115 = arith.constant 0 : index
    %c0_116 = arith.constant 0 : index
    %87 = vector.load %arg4[%c0_114, %c0_115, %c0_116] : memref<1x256x128xf32, #tpu.memory_space<vmem>>, vector<1x256x128xf32>
    %88 = vector.shape_cast %87 : vector<1x256x128xf32> to vector<256x128xf32>
    %89 = vector.shape_cast %86 : vector<256x128xf32> to vector<1x256x128xf32>
    tpu.vector_store %arg4[%c0_114, %c0_115, %c0_116], %89 {strides = array<i32>} : memref<1x256x128xf32, #tpu.memory_space<vmem>>, vector<1x256x128xf32>,
    return
  }
  func.func @transform_0(%arg0: i32) -> (i32, i32, i32, i32, i32) {
    %c0_i32 = arith.constant 0 : i32
    %c0_i32_0 = arith.constant 0 : i32
    %c0_i32_1 = arith.constant 0 : i32
    %c0_i32_2 = arith.constant 0 : i32
    %c0_i32_3 = arith.constant 0 : i32
    return %arg0, %c0_i32, %c0_i32_0, %c0_i32_1, %c0_i32_2 : i32, i32, i32, i32, i32
  }
  func.func @transform_1(%arg0: i32) -> (i32, i32, i32) {
    %c0_i32 = arith.constant 0 : i32
    %c0_i32_0 = arith.constant 0 : i32
    %c0_i32_1 = arith.constant 0 : i32
    %c0_i32_2 = arith.constant 0 : i32
    return %c0_i32, %c0_i32_0, %c0_i32_1 : i32, i32, i32
  }
  func.func @transform_2(%arg0: i32) -> (i32, i32) {
    %c0_i32 = arith.constant 0 : i32
    %c0_i32_0 = arith.constant 0 : i32
    %c0_i32_1 = arith.constant 0 : i32
    return %c0_i32, %c0_i32_0 : i32, i32
  }
  func.func @transform_3(%arg0: i32) -> (i32, i32, i32) {
    %c0_i32 = arith.constant 0 : i32
    %c0_i32_0 = arith.constant 0 : i32
    %c0_i32_1 = arith.constant 0 : i32
    return %arg0, %c0_i32, %c0_i32_0 : i32, i32, i32
  }
}

</mosaic_0001>

<bundles_post_ra>
// kernel: tpu_custom_call.1
= control target key start
LH: loop header
LB: loop body
LE: loop exit
PB: predicated region body
PF: predicated region fallthrough
CT: control target
= control target key end

     0   :  { %8 = vsyncpa [#allocation4], 0  ;;  %s5335_s0 = inlined_call_operand.vmem [shape: f32[2,1,18,18,4], index: 0, kind: input, shape index: {}]   ;;  %s5336_s1 = inlined_call_operand.vmem [shape: f32[9,4,128], index: 1, kind: input, shape index: {}]   ;;  %s5337_s2 = inlined_call_operand.vmem [shape: f32[1,128], index: 2, kind: input, shape index: {}]   ;;  %s5338_s3 = inlined_call_operand.hbm [shape: f32[2,256,128], index: 3, kind: output, shape index: {}]  }
   0x1   :  { %10 = vsyncpa [#allocation4 + $0x1], 0  ;;  %s4101_s12 = smov 0   ;;  %s4103_s13 = smov 0  }
   0x2   :  { %s4105_s14 = smov 0   ;;  %s4107_s15 = smov 0  }
   0x3 LB: > { %s4122_s16 = sadd.s32 4294967295, %s4077_s15   ;;  %s3460_s17 = sadd.s32 4294967294, %s4077_s15   ;;  %s4077_s15 = sphi %s4107_s15, %s5459_s15   ;;  %s4073_s14 = sphi %s4105_s14, %s5458_s14   ;;  %s4069_s13 = sphi %s4103_s13, %s5457_s13   ;;  %s4065_s12 = sphi %s4101_s12, %s5456_s12  }
   0x4   : > { %s4126_s18 = sadd.s32 1, %s4077_s15   ;;  %s91_s19 = sadd.s32 1, %s4073_s14 }
   0x5   : > { %s88_s20 = ssub.s32 %s4077_s15, %s4126_s18  ;;  %p101_p0 = scmp.ne.s32.totalorder %s4073_s14, %s4069_s13 }
   0x6   : > { %p89_p1 = scmp.eq.s32.totalorder %s88_s20, 0  ;;  %p102_p2 = scmp.eq.s32.totalorder %s4122_s16, 1 }
   0x7   : > { %p107_p3 = scmp.ne.s32.totalorder %s4069_s13, %s4065_s12  ;;  %p108_p4 = scmp.eq.s32.totalorder %s3460_s17, 1 }
   0x8   : > { %s4137_s21 = scalar_select %p89_p1, %s4073_s14, %s91_s19  }
   0x9   : > { %p4139_p5 = por %p102_p2, %p101_p0  ;;  %p4143_p6 = por %p108_p4, %p107_p3 }
   0xa   : > { %p3463_p7 = scmp.ge.s32.totalorder %s4077_s15, 1  ;;  %p140_p8 = scmp.lt.s32.totalorder %s4077_s15, 3 }
   0xc   : > { %p141_p9 = pnand %p3463_p7, %p140_p8 }
   0xe   : > { %144 = sbr.rel (%p141_p9) target bundleno = 740 (0x2e4), region = 32 }
  0x13   : > { %v265_v0 = vld [vmem:[%s5336_s1] sm:$0xf]  ;;  %vm363_vm0 = vcmask 1043456   ;;  %p164_p10 = scmp.lt.s32.totalorder %s4122_s16, 1  ;;  %v3533_v1 = vld [vmem:[%s5336_s1 + $0x8] sm:$0xf] }
  0x14   : > { %3969 = vmatpush.msk.msra.mxu1 %vm363_vm0, %v265_v0  ;;  %3970 = vmatpush.msk.msra.mxu2 %vm363_vm0, %v265_v0  ;;  %v3599_v2 = vld [vmem:[%s5336_s1 + $0xc] sm:$0xf]  ;;  %v3499_v3 = vld [vmem:[%s5336_s1 + $0x4] sm:$0xf]  ;;  %v3665_v4 = vld [vmem:[%s5336_s1 + $0x10] sm:$0xf] }
  0x15   : > { %s165_s5 = scalar_select %p164_p10, %s4122_s16, 1  ;;  %3971 = vmatpush.msk.msra.mxu3 %vm363_vm0, %v265_v0  ;;  %3466 = vmatpush.msk.msra.mxu0 %vm363_vm0, %v265_v0  ;;  %vm266_vm1 = vcmask 31744   ;;  %v3797_v25 = vld [vmem:[%s5336_s1 + $0x18] sm:$0xf]  ;;  %v3863_v26 = vld [vmem:[%s5336_s1 + $0x1c] sm:$0xf] }
  0x16   : > { %3534 = vmatpush.msk.msrb.mxu2 %vm363_vm0, %v3533_v1  ;;  %3500 = vmatpush.msk.msrb.mxu1 %vm363_vm0, %v3499_v3  ;;  %v3731_v27 = vld [vmem:[%s5336_s1 + $0x14] sm:$0xf]  ;;  %v3929_v32 = vld [vmem:[%s5336_s1 + $0x20] sm:$0xf]  ;;  %s161_s29 = sand.u32 1, %s4069_s13   ;;  %s3968_s7 = sshll.u32 %s4122_s16, 8 }
  0x17   : > { %3600 = vmatpush.msk.msrb.mxu3 %vm363_vm0, %v3599_v2  ;;  %s3972_s8 = smul.u32 432, %s165_s5  ;;  %3666 = vmatpush.msk.msrb.mxu0 %vm363_vm0, %v3665_v4  ;;  %s3464_s30 = sshll.u32 %s161_s29, 8 }
  0x18   : > { %s5096_s6 = scalar_lea.vmem [#allocation3], %s3464_s30  ;;  %s3394_s10 = scalar_lea.hbm %s5338_s3, %s3968_s7 }
  0x19   : > { %s4177_s11 = scalar_lea.vmem %s5335_s0, %s3972_s8  ;;  %s3397_s17 = sshll.u32 %s3394_s10, 4  ;;  %s3398_s17 = int_to_ptr.hbm [resolvable:$true] %s3397_s17 }
  0x1a   : > { %v4180_v5 = vld [vmem:[%s4177_s11 + $0x60] sm:$0xff]  ;;  %v4197_v9 = vld [vmem:[%s4177_s11 + $0x68] sm:$0xff]  ;;  %v4214_v13 = vld [vmem:[%s4177_s11 + $0x78] sm:$0xff]  ;;  %s3383_s16 = scalar_lea.sflag [#allocation4], %s161_s29  ;;  %s4029_s19 = sshra.s32 %s3398_s17, 4  ;;  %s4030_s19 = int_to_ptr.hbm [resolvable:$true] %s4029_s19 }
  0x1b   : > { %v4183_v6 = vld [vmem:[%s4177_s11 + $0xc0] sm:$0xff]  ;;  %3475 = vmatmul.msk.f32.vlgmr.msra.gmra.mxu1 %vm266_vm1, %v4180_v5  ;;  %v4200_v10 = vld [vmem:[%s4177_s11 + $0xc8] sm:$0xff]  ;;  %v4217_v14 = vld [vmem:[%s4177_s11 + $0xd8] sm:$0xff]  ;;  %s4031_s20 = scalar_lea.hbm %s4030_s19, 256  ;;  %s4035_s26 = scalar_lea.hbm %s5338_s3, 512 }
  0x1c   : > { %v4186_v7 = vld [vmem:[%s4177_s11 + $0x120] sm:$0xff]  ;;  %3483 = vmatmul.msk.f32.vlgmr.msra.gmra.mxu2 %vm266_vm1, %v4183_v6  ;;  %v4203_v11 = vld [vmem:[%s4177_s11 + $0x128] sm:$0xff]  ;;  %v4220_v15 = vld [vmem:[%s4177_s11 + $0x138] sm:$0xff]  ;;  %3732 = vmatpush.msk.msra.mxu1 %vm363_vm0, %v3731_v27  ;;  %p4032_p11 = scmp.ne.s32.totalorder %s4030_s19, %s4031_s20  ;;  %p4036_p0 = scmp.lt.s32.totalorder %s4030_s19, %s5338_s3 }
  0x1d   : > { %v201_v8 = vld [vmem:[%s4177_s11] sm:$0xff]  ;;  %3491 = vmatmul.msk.f32.vlgmr.msra.gmra.mxu3 %vm266_vm1, %v4186_v7  ;;  %v202_v12 = vld [vmem:[%s4177_s11 + $0x8] sm:$0xff]  ;;  %v203_v16 = vld [vmem:[%s4177_s11 + $0x18] sm:$0xff]  ;;  %3798 = vmatpush.msk.msra.mxu2 %vm363_vm0, %v3797_v25  ;;  %p4037_p1 = scmp.lt.s32.totalorder %s4035_s26, %s4031_s20 }
  0x1e   : > { %3467 = vmatmul.msk.f32.vlgmr.msra.gmra.mxu0 %vm266_vm1, %v201_v8  ;;  %v4231_v17 = vld [vmem:[%s4177_s11 + $0x80] sm:$0xff]  ;;  %v4248_v21 = vld [vmem:[%s4177_s11 + $0x90] sm:$0xff]  ;;  %3864 = vmatpush.msk.msra.mxu3 %vm363_vm0, %v3863_v26  ;;  %v4280_v28 = vld [vmem:[%s4177_s11 + $0x98] sm:$0xff]  ;;  %p4033_p12 = pnand %p4032_p11, %p4139_p5 }
  0x1f   : > { %v4234_v18 = vld [vmem:[%s4177_s11 + $0xe0] sm:$0xff]  ;;  %v4251_v22 = vld [vmem:[%s4177_s11 + $0xf0] sm:$0xff]  ;;  %v4283_v29 = vld [vmem:[%s4177_s11 + $0xf8] sm:$0xff]  ;;  %3930 = vmatpush.msk.msra.mxu0 %vm363_vm0, %v3929_v32  ;;  %p4038_p2 = por %p4037_p1, %p4036_p0 }
  0x20   : > { %v4237_v19 = vld [vmem:[%s4177_s11 + $0x140] sm:$0xff]  ;;  %v4254_v23 = vld [vmem:[%s4177_s11 + $0x150] sm:$0xff]  ;;  %v4286_v30 = vld [vmem:[%s4177_s11 + $0x158] sm:$0xff]  ;;  %p4034_p13 = pneg %p4033_p12 }
  0x21   : > { %v204_v20 = vld [vmem:[%s4177_s11 + $0x20] sm:$0xff]  ;;  %v4257_v24 = vld [vmem:[%s4177_s11 + $0x30] sm:$0xff]  ;;  %v4289_v31 = vld [vmem:[%s4177_s11 + $0x38] sm:$0xff] }
  0x22   : > { %v4304_v33 = vld [vmem:[%s4177_s11 + $0xa8] sm:$0xff]  ;;  %v4324_v37 = vld [vmem:[%s4177_s11 + $0xb0] sm:$0xff]  ;;  %v3633_v43 = vld [vmem:[%s4177_s11 + $0x19] sm:$0xff]  ;;  %p4039_p3 = pnand %p4038_p2, %p4034_p13 }
  0x23   : > { %3476 = vmatmul.msk.f32.gmra.mxu1 %vm266_vm1, %v4197_v9  ;;  %v4307_v34 = vld [vmem:[%s4177_s11 + $0x108] sm:$0xff]  ;;  %v4327_v38 = vld [vmem:[%s4177_s11 + $0x110] sm:$0xff]  ;;  %v4358_v47 = vld [vmem:[%s4177_s11 + $0x1a] sm:$0xff] }
  0x24   : > { %3484 = vmatmul.msk.f32.gmra.mxu2 %vm266_vm1, %v4200_v10  ;;  %v4310_v35 = vld [vmem:[%s4177_s11 + $0x168] sm:$0xff]  ;;  %v4330_v39 = vld [vmem:[%s4177_s11 + $0x170] sm:$0xff]  ;;  %v4374_v50 = vld [vmem:[%s4177_s11 + $0x39] sm:$0xff] }
  0x25   : > { %3492 = vmatmul.msk.f32.gmra.mxu3 %vm266_vm1, %v4203_v11  ;;  %v4313_v36 = vld [vmem:[%s4177_s11 + $0x48] sm:$0xff]  ;;  %v4333_v40 = vld [vmem:[%s4177_s11 + $0x50] sm:$0xff]  ;;  %v4398_v53 = vld [vmem:[%s4177_s11 + $0x3a] sm:$0xff] }
  0x26   : > { %3468 = vmatmul.msk.f32.gmra.mxu0 %vm266_vm1, %v202_v12  ;;  %v544_v41 = vld [vmem:[%s4177_s11 + $0x1] sm:$0xff]  ;;  %v545_v44 = vld [vmem:[%s4177_s11 + $0x9] sm:$0xff]  ;;  %v4361_v48 = vld [vmem:[%s4177_s11 + $0x31] sm:$0xff] }
  0x27   : > { %v886_v42 = vld [vmem:[%s4177_s11 + $0x2] sm:$0xff]  ;;  %v887_v45 = vld [vmem:[%s4177_s11 + $0xa] sm:$0xff]  ;;  %v4384_v51 = vld [vmem:[%s4177_s11 + $0x32] sm:$0xff] }
  0x28   : > { %v3634_v46 = vld [vmem:[%s4177_s11 + $0x21] sm:$0xff]  ;;  %v4387_v52 = vld [vmem:[%s4177_s11 + $0x49] sm:$0xff]  ;;  %v4401_v54 = vld [vmem:[%s4177_s11 + $0x51] sm:$0xff] }
  0x29   : > { %v4371_v49 = vld [vmem:[%s4177_s11 + $0x22] sm:$0xff]  ;;  %v4412_v55 = vld [vmem:[%s4177_s11 + $0x4a] sm:$0xff]  ;;  %v4426_v57 = vld [vmem:[%s4177_s11 + $0x52] sm:$0xff] }
  0x2a   : > { %v4415_v56 = vld [vmem:[%s4177_s11 + $0x61] sm:$0xff]  ;;  %v4429_v58 = vld [vmem:[%s4177_s11 + $0x69] sm:$0xff]  ;;  %v4447_v62 = vld [vmem:[%s4177_s11 + $0x79] sm:$0xff] }
  0x2b   : > { %3477 = vmatmul.msk.f32.gmra.mxu1 %vm266_vm1, %v4214_v13  ;;  %5368 = vst [vmem:[#allocation6_spill] sm:$0xff] %v4429_v58  ;;  %v4442_v60 = vld [vmem:[%s4177_s11 + $0x62] sm:$0xff]  ;;  %v4464_v2 = vld [vmem:[%s4177_s11 + $0x6a] sm:$0xff]  ;;  %v4486_v12 = vld [vmem:[%s4177_s11 + $0x7a] sm:$0xff] }
  0x2c   : > { %3485 = vmatmul.msk.f32.gmra.mxu2 %vm266_vm1, %v4217_v14  ;;  %5369 = vst [vmem:[#allocation7_spill] sm:$0xff] %v4447_v62  ;;  %v4469_v4 = vld [vmem:[%s4177_s11 + $0x81] sm:$0xff]  ;;  %v4513_v32 = vld [vmem:[%s4177_s11 + $0x99] sm:$0xff] }
  0x2d   : > { %3493 = vmatmul.msk.f32.gmra.mxu3 %vm266_vm1, %v4220_v15  ;;  %5371 = vst [vmem:[#allocation9_spill] sm:$0xff] %v4464_v2  ;;  %v4508_v26 = vld [vmem:[%s4177_s11 + $0x82] sm:$0xff] }
  0x2e   : > { %3469 = vmatmul.msk.f32.gmra.mxu0 %vm266_vm1, %v203_v16  ;;  %5372 = vst [vmem:[#allocation10_spill] sm:$0xff] %v4469_v4 }
  0x2f   : > { %5374 = vst [vmem:[#allocation12_spill] sm:$0xff] %v4486_v12 }
  0x30   : > { %5377 = vst [vmem:[#allocation15_spill] sm:$0xff] %v4508_v26 }
  0x31   : > { %5378 = vst [vmem:[#allocation16_spill] sm:$0xff] %v4513_v32 }
  0x33   : > { %3478 = vmatmul.msk.f32.gmra.mxu1 %vm266_vm1, %v4231_v17 }
  0x34   : > { %3486 = vmatmul.msk.f32.gmra.mxu2 %vm266_vm1, %v4234_v18 }
  0x35   : > { %3494 = vmatmul.msk.f32.gmra.mxu3 %vm266_vm1, %v4237_v19 }
  0x36   : > { %3470 = vmatmul.msk.f32.gmra.mxu0 %vm266_vm1, %v204_v20 }
  0x3b   : > { %3479 = vmatmul.msk.f32.gmra.mxu1 %vm266_vm1, %v4248_v21 }
  0x3c   : > { %3487 = vmatmul.msk.f32.gmra.mxu2 %vm266_vm1, %v4251_v22 }
  0x3d   : > { %3495 = vmatmul.msk.f32.gmra.mxu3 %vm266_vm1, %v4254_v23 }
  0x3e   : > { %3471 = vmatmul.msk.f32.gmra.mxu0 %vm266_vm1, %v4257_v24 }
  0x43   : > { %3480 = vmatmul.msk.f32.gmra.mxu1 %vm266_vm1, %v4280_v28 }
  0x44   : > { %3488 = vmatmul.msk.f32.gmra.mxu2 %vm266_vm1, %v4283_v29 }
  0x45   : > { %3496 = vmatmul.msk.f32.gmra.mxu3 %vm266_vm1, %v4286_v30 }
  0x46   : > { %3472 = vmatmul.msk.f32.gmra.mxu0 %vm266_vm1, %v4289_v31 }
  0x4b   : > { %3481 = vmatmul.msk.f32.gmra.mxu1 %vm266_vm1, %v4304_v33 }
  0x4c   : > { %3489 = vmatmul.msk.f32.gmra.mxu2 %vm266_vm1, %v4307_v34 }
  0x4d   : > { %3497 = vmatmul.msk.f32.gmra.mxu3 %vm266_vm1, %v4310_v35 }
  0x4e   : > { %3473 = vmatmul.msk.f32.gmra.mxu0 %vm266_vm1, %v4313_v36 }
  0x53   : > { %3482 = vmatmul.msk.f32.gmra.mxu1 %vm266_vm1, %v4324_v37 }
  0x54   : > { %3490 = vmatmul.msk.f32.gmra.mxu2 %vm266_vm1, %v4327_v38 }
  0x55   : > { %3498 = vmatmul.msk.f32.gmra.mxu3 %vm266_vm1, %v4330_v39 }
  0x56   : > { %3474 = vmatmul.msk.f32.gmra.mxu0 %vm266_vm1, %v4333_v40 }
  0x5b   : > { %3501 = vmatmul.msk.f32.vlgmr.msrb.gmra.mxu1 %vm266_vm1, %v544_v41 }
  0x5c   : > { %3535 = vmatmul.msk.f32.vlgmr.msrb.gmra.mxu2 %vm266_vm1, %v886_v42 }
  0x5d   : > { %3601 = vmatmul.msk.f32.vlgmr.msrb.gmra.mxu3 %vm266_vm1, %v203_v16  ;;  %v4491_v16 = vld [vmem:[%s4177_s11 + $0x91] sm:$0xff] }
  0x5e   : > { %3667 = vmatmul.msk.f32.vlgmr.msrb.gmra.mxu0 %vm266_vm1, %v3633_v43  ;;  %5375 = vst [vmem:[#allocation13_spill] sm:$0xff] %v4491_v16 }
  0x63   : > { %3502 = vmatmul.msk.f32.gmra.mxu1 %vm266_vm1, %v545_v44 }
  0x64   : > { %3536 = vmatmul.msk.f32.gmra.mxu2 %vm266_vm1, %v887_v45  ;;  %v4535_v45 = vld [vmem:[%s4177_s11 + $0xa9] sm:$0xff] }
  0x65   : > { %3602 = vmatmul.msk.f32.gmra.mxu3 %vm266_vm1, %v204_v20  ;;  %5381 = vst [vmem:[#allocation19_spill] sm:$0xff] %v4535_v45 }
  0x66   : > { %3668 = vmatmul.msk.f32.gmra.mxu0 %vm266_vm1, %v3634_v46 }
  0x6b   : > { %3503 = vmatmul.msk.f32.gmra.mxu1 %vm266_vm1, %v3633_v43  ;;  %v4530_v43 = vld [vmem:[%s4177_s11 + $0x92] sm:$0xff] }
  0x6c   : > { %3537 = vmatmul.msk.f32.gmra.mxu2 %vm266_vm1, %v4358_v47  ;;  %5380 = vst [vmem:[#allocation18_spill] sm:$0xff] %v4530_v43 }
  0x6d   : > { %3603 = vmatmul.msk.f32.gmra.mxu3 %vm266_vm1, %v4257_v24 }
  0x6e   : > { %3669 = vmatmul.msk.f32.gmra.mxu0 %vm266_vm1, %v4361_v48 }
  0x73   : > { %3504 = vmatmul.msk.f32.gmra.mxu1 %vm266_vm1, %v3634_v46 }
  0x74   : > { %3538 = vmatmul.msk.f32.gmra.mxu2 %vm266_vm1, %v4371_v49 }
  0x75   : > { %3604 = vmatmul.msk.f32.gmra.mxu3 %vm266_vm1, %v4289_v31 }
  0x76   : > { %3670 = vmatmul.msk.f32.gmra.mxu0 %vm266_vm1, %v4374_v50 }
  0x7b   : > { %3505 = vmatmul.msk.f32.gmra.mxu1 %vm266_vm1, %v4361_v48 }
  0x7c   : > { %3539 = vmatmul.msk.f32.gmra.mxu2 %vm266_vm1, %v4384_v51 }
  0x7d   : > { %3605 = vmatmul.msk.f32.gmra.mxu3 %vm266_vm1, %v4313_v36 }
  0x7e   : > { %3671 = vmatmul.msk.f32.gmra.mxu0 %vm266_vm1, %v4387_v52 }
  0x83   : > { %3506 = vmatmul.msk.f32.gmra.mxu1 %vm266_vm1, %v4374_v50 }
  0x84   : > { %3540 = vmatmul.msk.f32.gmra.mxu2 %vm266_vm1, %v4398_v53 }
  0x85   : > { %3606 = vmatmul.msk.f32.gmra.mxu3 %vm266_vm1, %v4333_v40 }
  0x86   : > { %3672 = vmatmul.msk.f32.gmra.mxu0 %vm266_vm1, %v4401_v54 }
  0x8b   : > { %3507 = vmatmul.msk.f32.gmra.mxu1 %vm266_vm1, %v4387_v52 }
  0x8c   : > { %3541 = vmatmul.msk.f32.gmra.mxu2 %vm266_vm1, %v4412_v55 }
  0x8d   : > { %3607 = vmatmul.msk.f32.gmra.mxu3 %vm266_vm1, %v4180_v5 }
  0x8e   : > { %3673 = vmatmul.msk.f32.gmra.mxu0 %vm266_vm1, %v4415_v56 }
  0x93   : > { %3508 = vmatmul.msk.f32.gmra.mxu1 %vm266_vm1, %v4401_v54 }
  0x94   : > { %3542 = vmatmul.msk.f32.gmra.mxu2 %vm266_vm1, %v4426_v57 }
  0x95   : > { %3608 = vmatmul.msk.f32.gmra.mxu3 %vm266_vm1, %v4197_v9 }
  0x96   : > { %3674 = vmatmul.msk.f32.gmra.mxu0 %vm266_vm1, %v4429_v58 }
  0x98   : > { %v4439_v59 = vpop.f32.mrf.mxu1 }
  0x9b   : > { %v4444_v61 = vpop.f32.mrf.mxu0  ;;  %3509 = vmatmul.msk.f32.gmra.mxu1 %vm266_vm1, %v4415_v56 }
  0x9c   : > { %3543 = vmatmul.msk.f32.gmra.mxu2 %vm266_vm1, %v4442_v60 }
  0x9d   : > { %3609 = vmatmul.msk.f32.gmra.mxu3 %vm266_vm1, %v4214_v13 }
  0x9e   : > { %3675 = vmatmul.msk.f32.gmra.mxu0 %vm266_vm1, %v4447_v62 }
  0x9f   : > { %v4457_v63 = vpop.f32.mrf.mxu2 }
  0xa0   : > { %v4459_v0 = vpop.f32.mrf.mxu3  ;;  %v4461_v1 = vpop.f32.mrf.mxu1 }
  0xa1   : > { %5370 = vst [vmem:[#allocation8_spill] sm:$0xff] %v4459_v0  ;;  %v4557_v0 = vld [vmem:[%s4177_s11 + $0xb1] sm:$0xff] }
  0xa2   : > { %5385 = vst [vmem:[#allocation23_spill] sm:$0xff] %v4557_v0 }
  0xa3   : > { %v4466_v3 = vpop.f32.mrf.mxu0  ;;  %3510 = vmatmul.msk.f32.gmra.mxu1 %vm266_vm1, %v4429_v58 }
  0xa4   : > { %3544 = vmatmul.msk.f32.gmra.mxu2 %vm266_vm1, %v4464_v2  ;;  %v4631_v2 = vld [vmem:[%s4177_s11 + $0xca] sm:$0xff] }
  0xa5   : > { %3610 = vmatmul.msk.f32.gmra.mxu3 %vm266_vm1, %v4231_v17 }
  0xa6   : > { %3676 = vmatmul.msk.f32.gmra.mxu0 %vm266_vm1, %v4469_v4 }
  0xa7   : > { %v4479_v5 = vpop.f32.mrf.mxu2 }
  0xa8   : > { %v4481_v8 = vpop.f32.mrf.mxu3  ;;  %v4483_v9 = vpop.f32.mrf.mxu1 }
  0xa9   : > { %5373 = vst [vmem:[#allocation11_spill] sm:$0xff] %v4481_v8 }
  0xab   : > { %v4488_v13 = vpop.f32.mrf.mxu0  ;;  %3511 = vmatmul.msk.f32.gmra.mxu1 %vm266_vm1, %v4447_v62 }
  0xac   : > { %3545 = vmatmul.msk.f32.gmra.mxu2 %vm266_vm1, %v4486_v12  ;;  %v4601_v12 = vld [vmem:[%s4177_s11 + $0xc9] sm:$0xff] }
  0xad   : > { %3611 = vmatmul.msk.f32.gmra.mxu3 %vm266_vm1, %v4248_v21 }
  0xae   : > { %3677 = vmatmul.msk.f32.gmra.mxu0 %vm266_vm1, %v4491_v16 }
  0xaf   : > { %v4501_v17 = vpop.f32.mrf.mxu2 }
  0xb0   : > { %v4503_v20 = vpop.f32.mrf.mxu3  ;;  %v4505_v25 = vpop.f32.mrf.mxu1 }
  0xb1   : > { %5376 = vst [vmem:[#allocation14_spill] sm:$0xff] %v4503_v20  ;;  %v4552_v20 = vld [vmem:[%s4177_s11 + $0x9a] sm:$0xff] }
  0xb2   : > { %5384 = vst [vmem:[#allocation22_spill] sm:$0xff] %v4552_v20 }
  0xb3   : > { %v4510_v27 = vpop.f32.mrf.mxu0  ;;  %3512 = vmatmul.msk.f32.gmra.mxu1 %vm266_vm1, %v4469_v4  ;;  %v4596_v4 = vld [vmem:[%s4177_s11 + $0xb2] sm:$0xff] }
  0xb4   : > { %3546 = vmatmul.msk.f32.gmra.mxu2 %vm266_vm1, %v4508_v26  ;;  %v4579_v26 = vld [vmem:[%s4177_s11 + $0xc1] sm:$0xff]  ;;  %5392 = vst [vmem:[#allocation30_spill] sm:$0xff] %v4596_v4 }
  0xb5   : > { %3612 = vmatmul.msk.f32.gmra.mxu3 %vm266_vm1, %v4280_v28  ;;  %5389 = vst [vmem:[#allocation27_spill] sm:$0xff] %v4579_v26 }
  0xb6   : > { %3678 = vmatmul.msk.f32.gmra.mxu0 %vm266_vm1, %v4513_v32 }
  0xb7   : > { %v4523_v21 = vpop.f32.mrf.mxu2 }
  0xb8   : > { %v4525_v41 = vpop.f32.mrf.mxu3  ;;  %v4527_v42 = vpop.f32.mrf.mxu1 }
  0xb9   : > { %5379 = vst [vmem:[#allocation17_spill] sm:$0xff] %v4525_v41 }
  0xbb   : > { %v4532_v44 = vpop.f32.mrf.mxu0  ;;  %3513 = vmatmul.msk.f32.gmra.mxu1 %vm266_vm1, %v4491_v16  ;;  %v4574_v16 = vld [vmem:[%s4177_s11 + $0xaa] sm:$0xff] }
  0xbc   : > { %3547 = vmatmul.msk.f32.gmra.mxu2 %vm266_vm1, %v4530_v43  ;;  %5388 = vst [vmem:[#allocation26_spill] sm:$0xff] %v4574_v16 }
  0xbd   : > { %3613 = vmatmul.msk.f32.gmra.mxu3 %vm266_vm1, %v4304_v33 }
  0xbe   : > { %3679 = vmatmul.msk.f32.gmra.mxu0 %vm266_vm1, %v4535_v45 }
  0xbf   : > { %v4545_v28 = vpop.f32.mrf.mxu2 }
  0xc0   : > { %5382 = vst [vmem:[#allocation20_spill] sm:$0xff] %v4545_v28  ;;  %v4547_v46 = vpop.f32.mrf.mxu3  ;;  %v4549_v41 = vpop.f32.mrf.mxu1  ;;  %v4634_v28 = vld [vmem:[%s4177_s11 + $0xe1] sm:$0xff] }
  0xc1   : > { %5383 = vst [vmem:[#allocation21_spill] sm:$0xff] %v4547_v46 }
  0xc3   : > { %v4554_v8 = vpop.f32.mrf.mxu0  ;;  %3514 = vmatmul.msk.f32.gmra.mxu1 %vm266_vm1, %v4513_v32 }
  0xc4   : > { %3548 = vmatmul.msk.f32.gmra.mxu2 %vm266_vm1, %v4552_v20 }
  0xc5   : > { %3614 = vmatmul.msk.f32.gmra.mxu3 %vm266_vm1, %v4324_v37 }
  0xc6   : > { %3680 = vmatmul.msk.f32.gmra.mxu0 %vm266_vm1, %v4557_v0 }
  0xc7   : > { %v4567_v33 = vpop.f32.mrf.mxu2 }
  0xc8   : > { %5386 = vst [vmem:[#allocation24_spill] sm:$0xff] %v4567_v33  ;;  %v4569_v46 = vpop.f32.mrf.mxu3  ;;  %v4571_v43 = vpop.f32.mrf.mxu1 }
  0xc9   : > { %5387 = vst [vmem:[#allocation25_spill] sm:$0xff] %v4569_v46 }
  0xcb   : > { %v4576_v32 = vpop.f32.mrf.mxu0  ;;  %3515 = vmatmul.msk.f32.gmra.mxu1 %vm266_vm1, %v4535_v45 }
  0xcc   : > { %3549 = vmatmul.msk.f32.gmra.mxu2 %vm266_vm1, %v4574_v16 }
  0xcd   : > { %3615 = vmatmul.msk.f32.gmra.mxu3 %vm266_vm1, %v4183_v6 }
  0xce   : > { %3681 = vmatmul.msk.f32.gmra.mxu0 %vm266_vm1, %v4579_v26 }
  0xcf   : > { %v4589_v37 = vpop.f32.mrf.mxu2 }
  0xd0   : > { %5390 = vst [vmem:[#allocation28_spill] sm:$0xff] %v4589_v37  ;;  %v4591_v46 = vpop.f32.mrf.mxu3  ;;  %v4593_v20 = vpop.f32.mrf.mxu1  ;;  %v4616_v37 = vld [vmem:[%s4177_s11 + $0xc2] sm:$0xff] }
  0xd1   : > { %5391 = vst [vmem:[#allocation29_spill] sm:$0xff] %v4591_v46 }
  0xd2   : > { %5395 = vst [vmem:[#allocation33_spill] sm:$0xff] %v4616_v37 }
  0xd3   : > { %v4598_v45 = vpop.f32.mrf.mxu0  ;;  %3516 = vmatmul.msk.f32.gmra.mxu1 %vm266_vm1, %v4557_v0  ;;  %v4619_v0 = vld [vmem:[%s4177_s11 + $0xd9] sm:$0xff] }
  0xd4   : > { %3550 = vmatmul.msk.f32.gmra.mxu2 %vm266_vm1, %v4596_v4 }
  0xd5   : > { %3616 = vmatmul.msk.f32.gmra.mxu3 %vm266_vm1, %v4200_v10 }
  0xd6   : > { %3682 = vmatmul.msk.f32.gmra.mxu0 %vm266_vm1, %v4601_v12 }
  0xd7   : > { %v4611_v6 = vpop.f32.mrf.mxu2 }
  0xd8   : > { %5393 = vst [vmem:[#allocation31_spill] sm:$0xff] %v4611_v6  ;;  %v4613_v46 = vpop.f32.mrf.mxu3  ;;  %v726_v16 = vpop.f32.mrf.mxu1 }
  0xd9   : > { %5394 = vst [vmem:[#allocation32_spill] sm:$0xff] %v4613_v46  ;;  %v822_v10 = vadd.f32 %v726_v16, %v4444_v61 }
  0xdb   : > { %v1753_v62 = vpop.f32.mrf.mxu0  ;;  %3517 = vmatmul.msk.f32.gmra.mxu1 %vm266_vm1, %v4579_v26 }
  0xdc   : > { %3551 = vmatmul.msk.f32.gmra.mxu2 %vm266_vm1, %v4616_v37 }
  0xdd   : > { %3617 = vmatmul.msk.f32.gmra.mxu3 %vm266_vm1, %v4217_v14 }
  0xde   : > { %3683 = vmatmul.msk.f32.gmra.mxu0 %vm266_vm1, %v4619_v0 }
  0xdf   : > { %v1068_v46 = vpop.f32.mrf.mxu2 }
  0xe0   : > { %v1164_v4 = vadd.f32 %v1068_v46, %v822_v10  ;;  %v1411_v6 = vpop.f32.mrf.mxu3  ;;  %v729_v33 = vpop.f32.mrf.mxu1  ;;  %v4651_v10 = vld [vmem:[%s4177_s11 + $0xf1] sm:$0xff] }
  0xe1   : > { %v823_v14 = vadd.f32 %v729_v33, %v4466_v3 }
  0xe2   : > { %v1507_v58 = vadd.f32 %v1411_v6, %v1164_v4 }
  0xe3   : > { %v1756_v26 = vpop.f32.mrf.mxu0  ;;  %3518 = vmatmul.msk.f32.gmra.mxu1 %vm266_vm1, %v4601_v12 }
  0xe4   : > { %v4636_v37 = vadd.f32 %v1753_v62, %v1507_v58  ;;  %3552 = vmatmul.msk.f32.gmra.mxu2 %vm266_vm1, %v4631_v2  ;;  %v4648_v62 = vld [vmem:[%s4177_s11 + $0xda] sm:$0xff] }
  0xe5   : > { %3618 = vmatmul.msk.f32.gmra.mxu3 %vm266_vm1, %v4234_v18 }
  0xe6   : > { %5396 = vst [vmem:[#allocation34_spill] sm:$0xff] %v4636_v37  ;;  %3684 = vmatmul.msk.f32.gmra.mxu0 %vm266_vm1, %v4634_v28 }
  0xe7   : > { %v1071_v61 = vpop.f32.mrf.mxu2 }
  0xe8   : > { %v1165_v4 = vadd.f32 %v1071_v61, %v823_v14  ;;  %v1414_v16 = vpop.f32.mrf.mxu3  ;;  %v732_v58 = vpop.f32.mrf.mxu1  ;;  %v4665_v61 = vld [vmem:[%s4177_s11 + $0xe2] sm:$0xff] }
  0xe9   : > { %v824_v18 = vadd.f32 %v732_v58, %v4488_v13 }
  0xea   : > { %v1508_v46 = vadd.f32 %v1414_v16, %v1165_v4 }
  0xeb   : > { %v1759_v6 = vpop.f32.mrf.mxu0  ;;  %3519 = vmatmul.msk.f32.gmra.mxu1 %vm266_vm1, %v4619_v0 }
  0xec   : > { %v4653_v37 = vadd.f32 %v1756_v26, %v1508_v46  ;;  %3553 = vmatmul.msk.f32.gmra.mxu2 %vm266_vm1, %v4648_v62  ;;  %v4668_v46 = vld [vmem:[%s4177_s11 + $0xf9] sm:$0xff] }
  0xed   : > { %3619 = vmatmul.msk.f32.gmra.mxu3 %vm266_vm1, %v4251_v22 }
  0xee   : > { %5397 = vst [vmem:[#allocation35_spill] sm:$0xff] %v4653_v37  ;;  %3685 = vmatmul.msk.f32.gmra.mxu0 %vm266_vm1, %v4651_v10 }
  0xef   : > { %v1074_v3 = vpop.f32.mrf.mxu2 }
  0xf0   : > { %v1166_v33 = vadd.f32 %v1074_v3, %v824_v18  ;;  %v1417_v14 = vpop.f32.mrf.mxu3  ;;  %v735_v26 = vpop.f32.mrf.mxu1  ;;  %v4682_v3 = vld [vmem:[%s4177_s11 + $0xf2] sm:$0xff] }
  0xf1   : > { %v825_v22 = vadd.f32 %v735_v26, %v4510_v27 }
  0xf2   : > { %v1509_v4 = vadd.f32 %v1417_v14, %v1166_v33 }
  0xf3   : > { %v1762_v16 = vpop.f32.mrf.mxu0  ;;  %3520 = vmatmul.msk.f32.gmra.mxu1 %vm266_vm1, %v4634_v28 }
  0xf4   : > { %v4670_v37 = vadd.f32 %v1759_v6, %v1509_v4  ;;  %3554 = vmatmul.msk.f32.gmra.mxu2 %vm266_vm1, %v4665_v61  ;;  %v4685_v4 = vld [vmem:[%s4177_s11 + $0x109] sm:$0xff] }
  0xf5   : > { %3620 = vmatmul.msk.f32.gmra.mxu3 %vm266_vm1, %v4283_v29 }
  0xf6   : > { %5398 = vst [vmem:[#allocation36_spill] sm:$0xff] %v4670_v37  ;;  %3686 = vmatmul.msk.f32.gmra.mxu0 %vm266_vm1, %v4668_v46 }
  0xf7   : > { %v1077_v13 = vpop.f32.mrf.mxu2 }
  0xf8   : > { %v1167_v58 = vadd.f32 %v1077_v13, %v825_v22  ;;  %v1420_v18 = vpop.f32.mrf.mxu3  ;;  %v738_v6 = vpop.f32.mrf.mxu1  ;;  %v4699_v13 = vld [vmem:[%s4177_s11 + $0xfa] sm:$0xff] }
  0xf9   : > { %v826_v29 = vadd.f32 %v738_v6, %v4532_v44 }
  0xfa   : > { %v1510_v33 = vadd.f32 %v1420_v18, %v1167_v58 }
  0xfb   : > { %v1765_v14 = vpop.f32.mrf.mxu0  ;;  %3521 = vmatmul.msk.f32.gmra.mxu1 %vm266_vm1, %v4651_v10 }
  0xfc   : > { %v4687_v37 = vadd.f32 %v1762_v16, %v1510_v33  ;;  %3555 = vmatmul.msk.f32.gmra.mxu2 %vm266_vm1, %v4682_v3  ;;  %v4702_v33 = vld [vmem:[%s4177_s11 + $0x111] sm:$0xff] }
  0xfd   : > { %3621 = vmatmul.msk.f32.gmra.mxu3 %vm266_vm1, %v4307_v34 }
  0xfe   : > { %5399 = vst [vmem:[#allocation37_spill] sm:$0xff] %v4687_v37  ;;  %3687 = vmatmul.msk.f32.gmra.mxu0 %vm266_vm1, %v4685_v4 }
  0xff   : > { %v1080_v27 = vpop.f32.mrf.mxu2 }
 0x100   : > { %v1168_v26 = vadd.f32 %v1080_v27, %v826_v29  ;;  %v1423_v22 = vpop.f32.mrf.mxu3  ;;  %v741_v16 = vpop.f32.mrf.mxu1  ;;  %v4716_v27 = vld [vmem:[%s4177_s11 + $0x10a] sm:$0xff] }
 0x101   : > { %v827_v34 = vadd.f32 %v741_v16, %v4554_v8 }
 0x102   : > { %v1511_v58 = vadd.f32 %v1423_v22, %v1168_v26 }
 0x103   : > { %v1768_v18 = vpop.f32.mrf.mxu0  ;;  %3522 = vmatmul.msk.f32.gmra.mxu1 %vm266_vm1, %v4668_v46 }
 0x104   : > { %v4704_v37 = vadd.f32 %v1765_v14, %v1511_v58  ;;  %3556 = vmatmul.msk.f32.gmra.mxu2 %vm266_vm1, %v4699_v13  ;;  %v4719_v58 = vld [vmem:[%s4177_s11 + $0x121] sm:$0xff] }
 0x105   : > { %3622 = vmatmul.msk.f32.gmra.mxu3 %vm266_vm1, %v4327_v38 }
 0x106   : > { %5400 = vst [vmem:[#allocation38_spill] sm:$0xff] %v4704_v37  ;;  %3688 = vmatmul.msk.f32.gmra.mxu0 %vm266_vm1, %v4702_v33 }
 0x107   : > { %v1083_v44 = vpop.f32.mrf.mxu2 }
 0x108   : > { %v1169_v6 = vadd.f32 %v1083_v44, %v827_v34  ;;  %v1426_v29 = vpop.f32.mrf.mxu3  ;;  %v744_v14 = vpop.f32.mrf.mxu1  ;;  %v4733_v44 = vld [vmem:[%s4177_s11 + $0x112] sm:$0xff] }
 0x109   : > { %v828_v38 = vadd.f32 %v744_v14, %v4576_v32 }
 0x10a   : > { %v1512_v26 = vadd.f32 %v1426_v29, %v1169_v6 }
 0x10b   : > { %v1771_v22 = vpop.f32.mrf.mxu0  ;;  %3523 = vmatmul.msk.f32.gmra.mxu1 %vm266_vm1, %v4685_v4 }
 0x10c   : > { %v4721_v37 = vadd.f32 %v1768_v18, %v1512_v26  ;;  %3557 = vmatmul.msk.f32.gmra.mxu2 %vm266_vm1, %v4716_v27  ;;  %v4736_v26 = vld [vmem:[%s4177_s11 + $0x129] sm:$0xff] }
 0x10d   : > { %3623 = vmatmul.msk.f32.gmra.mxu3 %vm266_vm1, %v4186_v7 }
 0x10e   : > { %5401 = vst [vmem:[#allocation39_spill] sm:$0xff] %v4721_v37  ;;  %3689 = vmatmul.msk.f32.gmra.mxu0 %vm266_vm1, %v4719_v58 }
 0x10f   : > { %v1086_v8 = vpop.f32.mrf.mxu2 }
 0x110   : > { %v1170_v16 = vadd.f32 %v1086_v8, %v828_v38  ;;  %v1429_v34 = vpop.f32.mrf.mxu3  ;;  %v747_v18 = vpop.f32.mrf.mxu1  ;;  %v4750_v8 = vld [vmem:[%s4177_s11 + $0x122] sm:$0xff] }
 0x111   : > { %v829_v7 = vadd.f32 %v747_v18, %v4598_v45 }
 0x112   : > { %v1513_v6 = vadd.f32 %v1429_v34, %v1170_v16 }
 0x113   : > { %v1774_v29 = vpop.f32.mrf.mxu0  ;;  %3524 = vmatmul.msk.f32.gmra.mxu1 %vm266_vm1, %v4702_v33 }
 0x114   : > { %v4738_v37 = vadd.f32 %v1771_v22, %v1513_v6  ;;  %3558 = vmatmul.msk.f32.gmra.mxu2 %vm266_vm1, %v4733_v44  ;;  %v4753_v6 = vld [vmem:[%s4177_s11 + $0x139] sm:$0xff] }
 0x115   : > { %3624 = vmatmul.msk.f32.gmra.mxu3 %vm266_vm1, %v4203_v11 }
 0x116   : > { %5402 = vst [vmem:[#allocation40_spill] sm:$0xff] %v4738_v37  ;;  %3690 = vmatmul.msk.f32.gmra.mxu0 %vm266_vm1, %v4736_v26 }
 0x117   : > { %v1089_v32 = vpop.f32.mrf.mxu2 }
 0x118   : > { %v1171_v14 = vadd.f32 %v1089_v32, %v829_v7  ;;  %v1432_v38 = vpop.f32.mrf.mxu3  ;;  %v750_v22 = vpop.f32.mrf.mxu1  ;;  %v4767_v32 = vld [vmem:[%s4177_s11 + $0x12a] sm:$0xff] }
 0x119   : > { %v830_v11 = vadd.f32 %v750_v22, %v4439_v59 }
 0x11a   : > { %v1514_v16 = vadd.f32 %v1432_v38, %v1171_v14 }
 0x11b   : > { %v1777_v34 = vpop.f32.mrf.mxu0  ;;  %3525 = vmatmul.msk.f32.gmra.mxu1 %vm266_vm1, %v4719_v58 }
 0x11c   : > { %v4755_v37 = vadd.f32 %v1774_v29, %v1514_v16  ;;  %3559 = vmatmul.msk.f32.gmra.mxu2 %vm266_vm1, %v4750_v8  ;;  %v4770_v16 = vld [vmem:[%s4177_s11 + $0x141] sm:$0xff] }
 0x11d   : > { %3625 = vmatmul.msk.f32.gmra.mxu3 %vm266_vm1, %v4220_v15 }
 0x11e   : > { %5403 = vst [vmem:[#allocation41_spill] sm:$0xff] %v4755_v37  ;;  %3691 = vmatmul.msk.f32.gmra.mxu0 %vm266_vm1, %v4753_v6 }
 0x11f   : > { %v1092_v45 = vpop.f32.mrf.mxu2 }
 0x120   : > { %v1172_v18 = vadd.f32 %v1092_v45, %v830_v11  ;;  %v1435_v7 = vpop.f32.mrf.mxu3  ;;  %v753_v29 = vpop.f32.mrf.mxu1  ;;  %v4784_v45 = vld [vmem:[%s4177_s11 + $0x13a] sm:$0xff] }
 0x121   : > { %v831_v15 = vadd.f32 %v753_v29, %v4461_v1 }
 0x122   : > { %v1515_v14 = vadd.f32 %v1435_v7, %v1172_v18 }
 0x123   : > { %v1780_v38 = vpop.f32.mrf.mxu0  ;;  %3526 = vmatmul.msk.f32.gmra.mxu1 %vm266_vm1, %v4736_v26 }
 0x124   : > { %v4772_v37 = vadd.f32 %v1777_v34, %v1515_v14  ;;  %3560 = vmatmul.msk.f32.gmra.mxu2 %vm266_vm1, %v4767_v32  ;;  %v4787_v14 = vld [vmem:[%s4177_s11 + $0x151] sm:$0xff] }
 0x125   : > { %3626 = vmatmul.msk.f32.gmra.mxu3 %vm266_vm1, %v4237_v19 }
 0x126   : > { %5404 = vst [vmem:[#allocation42_spill] sm:$0xff] %v4772_v37  ;;  %3692 = vmatmul.msk.f32.gmra.mxu0 %vm266_vm1, %v4770_v16 }
 0x127   : > { %v1095_v59 = vpop.f32.mrf.mxu2 }
 0x128   : > { %v1173_v22 = vadd.f32 %v1095_v59, %v831_v15  ;;  %v1438_v11 = vpop.f32.mrf.mxu3  ;;  %v756_v34 = vpop.f32.mrf.mxu1  ;;  %v4801_v59 = vld [vmem:[%s4177_s11 + $0x142] sm:$0xff] }
 0x129   : > { %v832_v19 = vadd.f32 %v756_v34, %v4483_v9 }
 0x12a   : > { %v1516_v18 = vadd.f32 %v1438_v11, %v1173_v22 }
 0x12b   : > { %v1783_v7 = vpop.f32.mrf.mxu0  ;;  %3527 = vmatmul.msk.f32.gmra.mxu1 %vm266_vm1, %v4753_v6 }
 0x12c   : > { %v4789_v37 = vadd.f32 %v1780_v38, %v1516_v18  ;;  %3561 = vmatmul.msk.f32.gmra.mxu2 %vm266_vm1, %v4784_v45  ;;  %v4804_v18 = vld [vmem:[%s4177_s11 + $0x159] sm:$0xff] }
 0x12d   : > { %3627 = vmatmul.msk.f32.gmra.mxu3 %vm266_vm1, %v4254_v23 }
 0x12e   : > { %5405 = vst [vmem:[#allocation43_spill] sm:$0xff] %v4789_v37  ;;  %3693 = vmatmul.msk.f32.gmra.mxu0 %vm266_vm1, %v4787_v14 }
 0x12f   : > { %v1098_v1 = vpop.f32.mrf.mxu2 }
 0x130   : > { %v1174_v29 = vadd.f32 %v1098_v1, %v832_v19  ;;  %v1441_v15 = vpop.f32.mrf.mxu3  ;;  %v759_v38 = vpop.f32.mrf.mxu1  ;;  %v4818_v1 = vld [vmem:[%s4177_s11 + $0x152] sm:$0xff] }
 0x131   : > { %v833_v23 = vadd.f32 %v759_v38, %v4505_v25 }
 0x132   : > { %v1517_v22 = vadd.f32 %v1441_v15, %v1174_v29 }
 0x133   : > { %v1786_v11 = vpop.f32.mrf.mxu0  ;;  %3528 = vmatmul.msk.f32.gmra.mxu1 %vm266_vm1, %v4770_v16 }
 0x134   : > { %v4806_v37 = vadd.f32 %v1783_v7, %v1517_v22  ;;  %3562 = vmatmul.msk.f32.gmra.mxu2 %vm266_vm1, %v4801_v59  ;;  %v4821_v22 = vld [vmem:[%s4177_s11 + $0x169] sm:$0xff] }
 0x135   : > { %3628 = vmatmul.msk.f32.gmra.mxu3 %vm266_vm1, %v4286_v30  ;;  %5407 = vst [vmem:[#allocation45_spill] sm:$0xff] %v4821_v22 }
 0x136   : > { %5406 = vst [vmem:[#allocation44_spill] sm:$0xff] %v4806_v37  ;;  %3694 = vmatmul.msk.f32.gmra.mxu0 %vm266_vm1, %v4804_v18 }
 0x137   : > { %v1101_v9 = vpop.f32.mrf.mxu2 }
 0x138   : > { %v1175_v34 = vadd.f32 %v1101_v9, %v833_v23  ;;  %v1444_v19 = vpop.f32.mrf.mxu3  ;;  %v762_v7 = vpop.f32.mrf.mxu1  ;;  %v4835_v9 = vld [vmem:[%s4177_s11 + $0x15a] sm:$0xff] }
 0x139   : > { %v834_v30 = vadd.f32 %v762_v7, %v4527_v42 }
 0x13a   : > { %v1518_v29 = vadd.f32 %v1444_v19, %v1175_v34 }
 0x13b   : > { %v1789_v15 = vpop.f32.mrf.mxu0  ;;  %3529 = vmatmul.msk.f32.gmra.mxu1 %vm266_vm1, %v4787_v14 }
 0x13c   : > { %v4823_v37 = vadd.f32 %v1786_v11, %v1518_v29  ;;  %3563 = vmatmul.msk.f32.gmra.mxu2 %vm266_vm1, %v4818_v1  ;;  %v4838_v29 = vld [vmem:[%s4177_s11 + $0x171] sm:$0xff] }
 0x13d   : > { %3629 = vmatmul.msk.f32.gmra.mxu3 %vm266_vm1, %v4310_v35 }
 0x13e   : > { %5408 = vst [vmem:[#allocation46_spill] sm:$0xff] %v4823_v37  ;;  %3695 = vmatmul.msk.f32.gmra.mxu0 %vm266_vm1, %v4821_v22 }
 0x13f   : > { %v1104_v25 = vpop.f32.mrf.mxu2 }
 0x140   : > { %v1176_v38 = vadd.f32 %v1104_v25, %v834_v30  ;;  %v1447_v23 = vpop.f32.mrf.mxu3  ;;  %v765_v11 = vpop.f32.mrf.mxu1 }
 0x141   : > { %v835_v35 = vadd.f32 %v765_v11, %v4549_v41 }
 0x142   : > { %v1519_v34 = vadd.f32 %v1447_v23, %v1176_v38  ;;  %v4855_v23 = vld [vmem:[%s4177_s11 + $0x180] sm:$0xff] }
 0x143   : > { %v1792_v19 = vpop.f32.mrf.mxu0  ;;  %3530 = vmatmul.msk.f32.gmra.mxu1 %vm266_vm1, %v4804_v18 }
 0x144   : > { %v4840_v37 = vadd.f32 %v1789_v15, %v1519_v34  ;;  %3564 = vmatmul.msk.f32.gmra.mxu2 %vm266_vm1, %v4835_v9  ;;  %v4852_v15 = vld [vmem:[%s4177_s11 + $0x16a] sm:$0xff] }
 0x145   : > { %3630 = vmatmul.msk.f32.gmra.mxu3 %vm266_vm1, %v4330_v39  ;;  %5410 = vst [vmem:[#allocation48_spill] sm:$0xff] %v4852_v15 }
 0x146   : > { %5409 = vst [vmem:[#allocation47_spill] sm:$0xff] %v4840_v37  ;;  %3696 = vmatmul.msk.f32.gmra.mxu0 %vm266_vm1, %v4838_v29  ;;  %v4858_v37 = vld [vmem:[%s4177_s11 + $0x181] sm:$0xff] }
 0x147   : > { %v1107_v42 = vpop.f32.mrf.mxu2 }
 0x148   : > { %v1177_v7 = vadd.f32 %v1107_v42, %v835_v35  ;;  %v1450_v30 = vpop.f32.mrf.mxu3  ;;  %v768_v25 = vpop.f32.mrf.mxu1 }
 0x149   : > { %v836_v41 = vadd.f32 %v768_v25, %v4571_v43 }
 0x14a   : > { %v1520_v38 = vadd.f32 %v1450_v30, %v1177_v7 }
 0x14b   : > { %v1795_v34 = vpop.f32.mrf.mxu0  ;;  %3531 = vmatmul.msk.f32.gmra.mxu1 %vm266_vm1, %v4821_v22  ;;  %v4878_v22 = vld [vmem:[%s4177_s11 + $0x189] sm:$0xff] }
 0x14c   : > { %v4860_v39 = vadd.f32 %v1792_v19, %v1520_v38  ;;  %3565 = vmatmul.msk.f32.gmra.mxu2 %vm266_vm1, %v4852_v15  ;;  %v4872_v19 = vld [vmem:[%s4177_s11 + $0x172] sm:$0xff]  ;;  %v4875_v38 = vld [vmem:[%s4177_s11 + $0x188] sm:$0xff] }
 0x14d   : > { %3631 = vmatmul.msk.f32.gmra.mxu3 %vm266_vm1, %v4855_v23 }
 0x14e   : > { %5411 = vst [vmem:[#allocation49_spill] sm:$0xff] %v4860_v39  ;;  %3697 = vmatmul.msk.f32.gmra.mxu0 %vm266_vm1, %v4858_v37 }
 0x14f   : > { %v1110_v11 = vpop.f32.mrf.mxu2 }
 0x150   : > { %v1178_v35 = vadd.f32 %v1110_v11, %v836_v41  ;;  %v1453_v42 = vpop.f32.mrf.mxu3  ;;  %v771_v7 = vpop.f32.mrf.mxu1 }
 0x151   : > { %v837_v43 = vadd.f32 %v771_v7, %v4593_v20 }
 0x152   : > { %v1521_v30 = vadd.f32 %v1453_v42, %v1178_v35 }
 0x153   : > { %v1798_v39 = vpop.f32.mrf.mxu0  ;;  %3532 = vmatmul.msk.f32.gmra.mxu1 %vm266_vm1, %v4838_v29 }
 0x154   : > { %v4880_v15 = vadd.f32 %v1795_v34, %v1521_v30  ;;  %3566 = vmatmul.msk.f32.gmra.mxu2 %vm266_vm1, %v4872_v19 }
 0x155   : > { %3632 = vmatmul.msk.f32.gmra.mxu3 %vm266_vm1, %v4875_v38 }
 0x156   : > { %3698 = vmatmul.msk.f32.gmra.mxu0 %vm266_vm1, %v4878_v22 }
 0x157   : > { %v1113_v25 = vpop.f32.mrf.mxu2 }
 0x158   : > { %v1179_v41 = vadd.f32 %v1113_v25, %v837_v43  ;;  %v1456_v11 = vpop.f32.mrf.mxu3  ;;  %v774_v35 = vpop.f32.mrf.mxu1 }
 0x159   : > { %v838_v20 = vadd.f32 %v774_v35, %v4457_v63 }
 0x15a   : > { %v1522_v34 = vadd.f32 %v1456_v11, %v1179_v41 }
 0x15b   : > { %v1801_v42 = vpop.f32.mrf.mxu0  ;;  %3733 = vmatmul.msk.f32.vlgmr.msra.gmra.mxu1 %vm266_vm1, %v4358_v47 }
 0x15c   : > { %v4891_v30 = vadd.f32 %v1798_v39, %v1522_v34  ;;  %3799 = vmatmul.msk.f32.vlgmr.msra.gmra.mxu2 %vm266_vm1, %v4257_v24 }
 0x15d   : > { %3865 = vmatmul.msk.f32.vlgmr.msra.gmra.mxu3 %vm266_vm1, %v4361_v48 }
 0x15e   : > { %3931 = vmatmul.msk.f32.vlgmr.msra.gmra.mxu0 %vm266_vm1, %v4384_v51 }
 0x15f   : > { %v1116_v7 = vpop.f32.mrf.mxu2 }
 0x160   : > { %v1180_v43 = vadd.f32 %v1116_v7, %v838_v20  ;;  %v1459_v25 = vpop.f32.mrf.mxu3  ;;  %v777_v41 = vpop.f32.mrf.mxu1 }
 0x161   : > { %v839_v24 = vadd.f32 %v777_v41, %v4479_v5 }
 0x162   : > { %v1523_v39 = vadd.f32 %v1459_v25, %v1180_v43 }
 0x163   : > { %v1804_v11 = vpop.f32.mrf.mxu0  ;;  %3734 = vmatmul.msk.f32.gmra.mxu1 %vm266_vm1, %v4371_v49 }
 0x164   : > { %v4902_v34 = vadd.f32 %v1801_v42, %v1523_v39  ;;  %3800 = vmatmul.msk.f32.gmra.mxu2 %vm266_vm1, %v4289_v31 }
 0x165   : > { %3866 = vmatmul.msk.f32.gmra.mxu3 %vm266_vm1, %v4374_v50 }
 0x166   : > { %3932 = vmatmul.msk.f32.gmra.mxu0 %vm266_vm1, %v4398_v53 }
 0x167   : > { %v1119_v47 = vpop.f32.mrf.mxu2 }
 0x168   : > { %v1181_v48 = vadd.f32 %v1119_v47, %v839_v24  ;;  %v1462_v63 = vpop.f32.mrf.mxu3  ;;  %v780_v35 = vpop.f32.mrf.mxu1  ;;  %v3769_v24 = vld [vmem:[%s4177_s11 + $0x60] sm:$0xff] }
 0x169   : > { %v840_v31 = vadd.f32 %v780_v35, %v4501_v17 }
 0x16a   : > { %v1524_v42 = vadd.f32 %v1462_v63, %v1181_v48 }
 0x16b   : > { %v1807_v20 = vpop.f32.mrf.mxu0  ;;  %3735 = vmatmul.msk.f32.gmra.mxu1 %vm266_vm1, %v4384_v51 }
 0x16c   : > { %v4913_v7 = vadd.f32 %v1804_v11, %v1524_v42  ;;  %3801 = vmatmul.msk.f32.gmra.mxu2 %vm266_vm1, %v4313_v36 }
 0x16d   : > { %3867 = vmatmul.msk.f32.gmra.mxu3 %vm266_vm1, %v4387_v52 }
 0x16e   : > { %3933 = vmatmul.msk.f32.gmra.mxu0 %vm266_vm1, %v4412_v55 }
 0x16f   : > { %v1122_v49 = vpop.f32.mrf.mxu2 }
 0x170   : > { %v1182_v50 = vadd.f32 %v1122_v49, %v840_v31  ;;  %v1465_v5 = vpop.f32.mrf.mxu3  ;;  %v783_v43 = vpop.f32.mrf.mxu1 }
 0x171   : > { %v841_v36 = vadd.f32 %v783_v43, %v4523_v21 }
 0x172   : > { %v1525_v25 = vadd.f32 %v1465_v5, %v1182_v50  ;;  %v5415_v5 = vld [vmem:[#allocation24_spill] sm:$0xff] }
 0x173   : > { %v1810_v41 = vpop.f32.mrf.mxu0  ;;  %3736 = vmatmul.msk.f32.gmra.mxu1 %vm266_vm1, %v4398_v53 }
 0x174   : > { %v4924_v39 = vadd.f32 %v1807_v20, %v1525_v25  ;;  %3802 = vmatmul.msk.f32.gmra.mxu2 %vm266_vm1, %v4333_v40  ;;  %v5412_v40 = vld [vmem:[#allocation20_spill] sm:$0xff]  ;;  %v3770_v20 = vld [vmem:[%s4177_s11 + $0x68] sm:$0xff] }
 0x175   : > { %3868 = vmatmul.msk.f32.gmra.mxu3 %vm266_vm1, %v4401_v54 }
 0x176   : > { %3934 = vmatmul.msk.f32.gmra.mxu0 %vm266_vm1, %v4426_v57 }
 0x177   : > { %v1125_v51 = vpop.f32.mrf.mxu2 }
 0x178   : > { %v1183_v52 = vadd.f32 %v1125_v51, %v841_v36  ;;  %v1468_v17 = vpop.f32.mrf.mxu3  ;;  %v786_v11 = vpop.f32.mrf.mxu1 }
 0x179   : > { %v842_v54 = vadd.f32 %v786_v11, %v5412_v40 }
 0x17a   : > { %v1526_v47 = vadd.f32 %v1468_v17, %v1183_v52  ;;  %v3771_v52 = vld [vmem:[%s4177_s11 + $0x78] sm:$0xff] }
 0x17b   : > { %v1813_v48 = vpop.f32.mrf.mxu0  ;;  %3737 = vmatmul.msk.f32.gmra.mxu1 %vm266_vm1, %v4412_v55  ;;  %v5413_v55 = vld [vmem:[#allocation6_spill] sm:$0xff] }
 0x17c   : > { %v4936_v53 = vadd.f32 %v1810_v41, %v1526_v47  ;;  %3803 = vmatmul.msk.f32.gmra.mxu2 %vm266_vm1, %v3769_v24  ;;  %v5417_v47 = vld [vmem:[#allocation12_spill] sm:$0xff] }
 0x17d   : > { %3869 = vmatmul.msk.f32.gmra.mxu3 %vm266_vm1, %v4415_v56  ;;  %v5414_v56 = vld [vmem:[#allocation9_spill] sm:$0xff] }
 0x17e   : > { %3935 = vmatmul.msk.f32.gmra.mxu0 %vm266_vm1, %v4442_v60 }
 0x17f   : > { %v1128_v21 = vpop.f32.mrf.mxu2 }
 0x180   : > { %v1184_v63 = vadd.f32 %v1128_v21, %v842_v54  ;;  %v1471_v35 = vpop.f32.mrf.mxu3  ;;  %v789_v42 = vpop.f32.mrf.mxu1 }
 0x181   : > { %v843_v43 = vadd.f32 %v789_v42, %v5415_v5  ;;  %v3772_v42 = vld [vmem:[%s4177_s11 + $0x80] sm:$0xff]  ;;  %v5421_v5 = vld [vmem:[#allocation31_spill] sm:$0xff] }
 0x182   : > { %v1527_v31 = vadd.f32 %v1471_v35, %v1184_v63 }
 0x183   : > { %v1816_v49 = vpop.f32.mrf.mxu0  ;;  %3738 = vmatmul.msk.f32.gmra.mxu1 %vm266_vm1, %v4426_v57  ;;  %v5416_v57 = vld [vmem:[#allocation7_spill] sm:$0xff] }
 0x184   : > { %v4947_v50 = vadd.f32 %v1813_v48, %v1527_v31  ;;  %3804 = vmatmul.msk.f32.gmra.mxu2 %vm266_vm1, %v3770_v20  ;;  %v5418_v48 = vld [vmem:[#allocation28_spill] sm:$0xff] }
 0x185   : > { %3870 = vmatmul.msk.f32.gmra.mxu3 %vm266_vm1, %v5413_v55  ;;  %v5420_v55 = vld [vmem:[#allocation15_spill] sm:$0xff] }
 0x186   : > { %3936 = vmatmul.msk.f32.gmra.mxu0 %vm266_vm1, %v5414_v56 }
 0x187   : > { %v1131_v25 = vpop.f32.mrf.mxu2 }
 0x188   : > { %v1185_v41 = vadd.f32 %v1131_v25, %v843_v43  ;;  %v1474_v36 = vpop.f32.mrf.mxu3  ;;  %v792_v51 = vpop.f32.mrf.mxu1 }
 0x189   : > { %v844_v40 = vadd.f32 %v792_v51, %v5418_v48  ;;  %v5423_v48 = vld [vmem:[#allocation18_spill] sm:$0xff] }
 0x18a   : > { %v1528_v17 = vadd.f32 %v1474_v36, %v1185_v41 }
 0x18b   : > { %v1819_v11 = vpop.f32.mrf.mxu0  ;;  %3739 = vmatmul.msk.f32.gmra.mxu1 %vm266_vm1, %v4442_v60  ;;  %v5419_v60 = vld [vmem:[#allocation10_spill] sm:$0xff] }
 0x18c   : > { %v4958_v24 = vadd.f32 %v1816_v49, %v1528_v17  ;;  %3805 = vmatmul.msk.f32.gmra.mxu2 %vm266_vm1, %v3771_v52  ;;  %v3773_v52 = vld [vmem:[%s4177_s11 + $0x90] sm:$0xff] }
 0x18d   : > { %3871 = vmatmul.msk.f32.gmra.mxu3 %vm266_vm1, %v5416_v57 }
 0x18e   : > { %3937 = vmatmul.msk.f32.gmra.mxu0 %vm266_vm1, %v5417_v47 }
 0x18f   : > { %v1134_v54 = vpop.f32.mrf.mxu2 }
 0x190   : > { %v1186_v21 = vadd.f32 %v1134_v54, %v844_v40  ;;  %v1477_v63 = vpop.f32.mrf.mxu3  ;;  %v795_v35 = vpop.f32.mrf.mxu1  ;;  %v5424_v40 = vld [vmem:[#allocation8_spill] sm:$0xff] }
 0x191   : > { %v845_v43 = vadd.f32 %v795_v35, %v5421_v5 }
 0x192   : > { %v1529_v20 = vadd.f32 %v1477_v63, %v1186_v21 }
 0x193   : > { %v1822_v31 = vpop.f32.mrf.mxu0  ;;  %3740 = vmatmul.msk.f32.gmra.mxu1 %vm266_vm1, %v5414_v56  ;;  %v5422_v56 = vld [vmem:[#allocation13_spill] sm:$0xff] }
 0x194   : > { %v4969_v49 = vadd.f32 %v1819_v11, %v1529_v20  ;;  %3806 = vmatmul.msk.f32.gmra.mxu2 %vm266_vm1, %v3772_v42  ;;  %v3774_v20 = vld [vmem:[%s4177_s11 + $0x98] sm:$0xff] }
 0x195   : > { %3872 = vmatmul.msk.f32.gmra.mxu3 %vm266_vm1, %v5419_v60 }
 0x196   : > { %3938 = vmatmul.msk.f32.gmra.mxu0 %vm266_vm1, %v5420_v55 }
 0x197   : > { %v1137_v25 = vpop.f32.mrf.mxu2 }
 0x198   : > { %v1187_v41 = vadd.f32 %v1137_v25, %v845_v43  ;;  %v1480_v36 = vpop.f32.mrf.mxu3  ;;  %v798_v51 = vpop.f32.mrf.mxu1  ;;  %v5426_v43 = vld [vmem:[#allocation22_spill] sm:$0xff]  ;;  %v5427_v25 = vld [vmem:[#allocation11_spill] sm:$0xff] }
 0x199   : > { %v846_v54 = vadd.f32 %v798_v51, %v5424_v40 }
 0x19a   : > { %v1530_v17 = vadd.f32 %v1480_v36, %v1187_v41 }
 0x19b   : > { %v1825_v11 = vpop.f32.mrf.mxu0  ;;  %3741 = vmatmul.msk.f32.gmra.mxu1 %vm266_vm1, %v5417_v47  ;;  %v5425_v47 = vld [vmem:[#allocation16_spill] sm:$0xff] }
 0x19c   : > { %v4980_v57 = vadd.f32 %v1822_v31, %v1530_v17  ;;  %3807 = vmatmul.msk.f32.gmra.mxu2 %vm266_vm1, %v3773_v52 }
 0x19d   : > { %3873 = vmatmul.msk.f32.gmra.mxu3 %vm266_vm1, %v5422_v56 }
 0x19e   : > { %3939 = vmatmul.msk.f32.gmra.mxu0 %vm266_vm1, %v5423_v48 }
 0x19f   : > { %v1140_v21 = vpop.f32.mrf.mxu2 }
 0x1a0   : > { %v1188_v63 = vadd.f32 %v1140_v21, %v846_v54  ;;  %v1483_v35 = vpop.f32.mrf.mxu3  ;;  %v801_v42 = vpop.f32.mrf.mxu1  ;;  %v5429_v21 = vld [vmem:[#allocation26_spill] sm:$0xff] }
 0x1a1   : > { %v847_v41 = vadd.f32 %v801_v42, %v5427_v25 }
 0x1a2   : > { %v1531_v31 = vadd.f32 %v1483_v35, %v1188_v63  ;;  %v5430_v63 = vld [vmem:[#allocation14_spill] sm:$0xff] }
 0x1a3   : > { %v1828_v60 = vpop.f32.mrf.mxu0  ;;  %3742 = vmatmul.msk.f32.gmra.mxu1 %vm266_vm1, %v5420_v55  ;;  %v5428_v55 = vld [vmem:[#allocation19_spill] sm:$0xff] }
 0x1a4   : > { %v4991_v5 = vadd.f32 %v1825_v11, %v1531_v31  ;;  %3808 = vmatmul.msk.f32.gmra.mxu2 %vm266_vm1, %v3774_v20  ;;  %v3775_v11 = vld [vmem:[%s4177_s11 + $0xa8] sm:$0xff] }
 0x1a5   : > { %3874 = vmatmul.msk.f32.gmra.mxu3 %vm266_vm1, %v5425_v47 }
 0x1a6   : > { %3940 = vmatmul.msk.f32.gmra.mxu0 %vm266_vm1, %v5426_v43 }
 0x1a7   : > { %v1143_v36 = vpop.f32.mrf.mxu2 }
 0x1a8   : > { %v1189_v51 = vadd.f32 %v1143_v36, %v847_v41  ;;  %v1486_v52 = vpop.f32.mrf.mxu3  ;;  %v804_v17 = vpop.f32.mrf.mxu1 }
 0x1a9   : > { %v848_v35 = vadd.f32 %v804_v17, %v5430_v63 }
 0x1aa   : > { %v1532_v56 = vadd.f32 %v1486_v52, %v1189_v51  ;;  %v5432_v51 = vld [vmem:[#allocation30_spill] sm:$0xff]  ;;  %v5433_v52 = vld [vmem:[#allocation17_spill] sm:$0xff] }
 0x1ab   : > { %v1831_v40 = vpop.f32.mrf.mxu0  ;;  %3743 = vmatmul.msk.f32.gmra.mxu1 %vm266_vm1, %v5423_v48  ;;  %v5431_v48 = vld [vmem:[#allocation23_spill] sm:$0xff] }
 0x1ac   : > { %v5002_v54 = vadd.f32 %v1828_v60, %v1532_v56  ;;  %3809 = vmatmul.msk.f32.gmra.mxu2 %vm266_vm1, %v3775_v11  ;;  %v3776_v60 = vld [vmem:[%s4177_s11 + $0xb0] sm:$0xff] }
 0x1ad   : > { %3875 = vmatmul.msk.f32.gmra.mxu3 %vm266_vm1, %v5428_v55 }
 0x1ae   : > { %3941 = vmatmul.msk.f32.gmra.mxu0 %vm266_vm1, %v5429_v21 }
 0x1af   : > { %v1146_v42 = vpop.f32.mrf.mxu2 }
 0x1b0   : > { %v1190_v20 = vadd.f32 %v1146_v42, %v848_v35  ;;  %v1489_v31 = vpop.f32.mrf.mxu3  ;;  %v807_v47 = vpop.f32.mrf.mxu1 }
 0x1b1   : > { %v849_v17 = vadd.f32 %v807_v47, %v5433_v52  ;;  %v5436_v47 = vld [vmem:[#allocation21_spill] sm:$0xff] }
 0x1b2   : > { %v1533_v25 = vadd.f32 %v1489_v31, %v1190_v20  ;;  %v5435_v31 = vld [vmem:[#allocation33_spill] sm:$0xff] }
 0x1b3   : > { %v1834_v41 = vpop.f32.mrf.mxu0  ;;  %3744 = vmatmul.msk.f32.gmra.mxu1 %vm266_vm1, %v5426_v43  ;;  %v5434_v43 = vld [vmem:[#allocation27_spill] sm:$0xff] }
 0x1b4   : > { %v5013_v36 = vadd.f32 %v1831_v40, %v1533_v25  ;;  %3810 = vmatmul.msk.f32.gmra.mxu2 %vm266_vm1, %v3776_v60  ;;  %v3777_v40 = vld [vmem:[%s4177_s11 + $0xc0] sm:$0xff] }
 0x1b5   : > { %3876 = vmatmul.msk.f32.gmra.mxu3 %vm266_vm1, %v5431_v48 }
 0x1b6   : > { %3942 = vmatmul.msk.f32.gmra.mxu0 %vm266_vm1, %v5432_v51 }
 0x1b7   : > { %v1149_v11 = vpop.f32.mrf.mxu2 }
 0x1b8   : > { %v1191_v56 = vadd.f32 %v1149_v11, %v849_v17  ;;  %v1492_v55 = vpop.f32.mrf.mxu3  ;;  %v810_v63 = vpop.f32.mrf.mxu1 }
 0x1b9   : > { %v850_v60 = vadd.f32 %v810_v63, %v5436_v47 }
 0x1ba   : > { %v1534_v35 = vadd.f32 %v1492_v55, %v1191_v56 }
 0x1bb   : > { %v1837_v42 = vpop.f32.mrf.mxu0  ;;  %3745 = vmatmul.msk.f32.gmra.mxu1 %vm266_vm1, %v5429_v21  ;;  %v5437_v21 = vld [vmem:[#allocation25_spill] sm:$0xff] }
 0x1bc   : > { %v5024_v20 = vadd.f32 %v1834_v41, %v1534_v35  ;;  %3811 = vmatmul.msk.f32.gmra.mxu2 %vm266_vm1, %v3777_v40  ;;  %v3778_v41 = vld [vmem:[%s4177_s11 + $0xc8] sm:$0xff] }
 0x1bd   : > { %3877 = vmatmul.msk.f32.gmra.mxu3 %vm266_vm1, %v5434_v43 }
 0x1be   : > { %3943 = vmatmul.msk.f32.gmra.mxu0 %vm266_vm1, %v5435_v31 }
 0x1bf   : > { %v1152_v25 = vpop.f32.mrf.mxu2 }
 0x1c0   : > { %v1192_v48 = vadd.f32 %v1152_v25, %v850_v60  ;;  %v1495_v52 = vpop.f32.mrf.mxu3  ;;  %v813_v17 = vpop.f32.mrf.mxu1 }
 0x1c1   : > { %v851_v63 = vadd.f32 %v813_v17, %v5437_v21 }
 0x1c2   : > { %v1535_v11 = vadd.f32 %v1495_v52, %v1192_v48 }
 0x1c3   : > { %v1840_v56 = vpop.f32.mrf.mxu0  ;;  %3746 = vmatmul.msk.f32.gmra.mxu1 %vm266_vm1, %v5432_v51 }
 0x1c4   : > { %v5035_v55 = vadd.f32 %v1837_v42, %v1535_v11  ;;  %3812 = vmatmul.msk.f32.gmra.mxu2 %vm266_vm1, %v3778_v41  ;;  %v3779_v42 = vld [vmem:[%s4177_s11 + $0xd8] sm:$0xff] }
 0x1c5   : > { %3878 = vmatmul.msk.f32.gmra.mxu3 %vm266_vm1, %v4601_v12  ;;  %v5438_v12 = vld [vmem:[#allocation29_spill] sm:$0xff] }
 0x1c6   : > { %3944 = vmatmul.msk.f32.gmra.mxu0 %vm266_vm1, %v4631_v2 }
 0x1c7   : > { %v1155_v40 = vpop.f32.mrf.mxu2 }
 0x1c8   : > { %v1193_v35 = vadd.f32 %v1155_v40, %v851_v63  ;;  %v1498_v43 = vpop.f32.mrf.mxu3  ;;  %v816_v47 = vpop.f32.mrf.mxu1 }
 0x1c9   : > { %v852_v51 = vadd.f32 %v816_v47, %v5438_v12 }
 0x1ca   : > { %v1536_v60 = vadd.f32 %v1498_v43, %v1193_v35 }
 0x1cb   : > { %v1843_v25 = vpop.f32.mrf.mxu0  ;;  %3747 = vmatmul.msk.f32.gmra.mxu1 %vm266_vm1, %v5435_v31 }
 0x1cc   : > { %v5046_v48 = vadd.f32 %v1840_v56, %v1536_v60  ;;  %3813 = vmatmul.msk.f32.gmra.mxu2 %vm266_vm1, %v3779_v42  ;;  %v3780_v56 = vld [vmem:[%s4177_s11 + $0xe0] sm:$0xff]  ;;  %v3781_v60 = vld [vmem:[%s4177_s11 + $0xf0] sm:$0xff] }
 0x1cd   : > { %3879 = vmatmul.msk.f32.gmra.mxu3 %vm266_vm1, %v4619_v0  ;;  %v5439_v0 = vld [vmem:[#allocation32_spill] sm:$0xff] }
 0x1ce   : > { %3945 = vmatmul.msk.f32.gmra.mxu0 %vm266_vm1, %v4648_v62 }
 0x1cf   : > { %v1158_v52 = vpop.f32.mrf.mxu2 }
 0x1d0   : > { %v1194_v17 = vadd.f32 %v1158_v52, %v852_v51  ;;  %v1501_v41 = vpop.f32.mrf.mxu3  ;;  %v819_v11 = vpop.f32.mrf.mxu1 }
 0x1d1   : > { %v853_v31 = vadd.f32 %v819_v11, %v5439_v0  ;;  %v5441_v0 = vld [vmem:[#allocation35_spill] sm:$0xff] }
 0x1d2   : > { %v1537_v21 = vadd.f32 %v1501_v41, %v1194_v17 }
 0x1d3   : > { %v1846_v63 = vpop.f32.mrf.mxu0  ;;  %3748 = vmatmul.msk.f32.gmra.mxu1 %vm266_vm1, %v4631_v2 }
 0x1d4   : > { %v5057_v40 = vadd.f32 %v1843_v25, %v1537_v21  ;;  %3814 = vmatmul.msk.f32.gmra.mxu2 %vm266_vm1, %v3780_v56  ;;  %v3782_v56 = vld [vmem:[%s4177_s11 + $0xf8] sm:$0xff] }
 0x1d5   : > { %3880 = vmatmul.msk.f32.gmra.mxu3 %vm266_vm1, %v4634_v28  ;;  %v5440_v28 = vld [vmem:[#allocation34_spill] sm:$0xff] }
 0x1d6   : > { %3946 = vmatmul.msk.f32.gmra.mxu0 %vm266_vm1, %v4665_v61 }
 0x1d7   : > { %v1161_v35 = vpop.f32.mrf.mxu2 }
 0x1d8   : > { %v1195_v43 = vadd.f32 %v1161_v35, %v853_v31  ;;  %v1504_v47 = vpop.f32.mrf.mxu3  ;;  %v2095_v42 = vpop.f32.mrf.mxu1 }
 0x1d9   : > { %v2191_v51 = vadd.f32 %v2095_v42, %v5440_v28  ;;  %v5442_v28 = vld [vmem:[#allocation36_spill] sm:$0xff] }
 0x1da   : > { %v1538_v25 = vadd.f32 %v1504_v47, %v1195_v43 }
 0x1db   : > { %v3122_v2 = vpop.f32.mrf.mxu0  ;;  %3749 = vmatmul.msk.f32.gmra.mxu1 %vm266_vm1, %v4648_v62  ;;  %v5085_v62 = vld [vmem:[%s5337_s2] ss:$0 sm:$0xff] }
 0x1dc   : > { %v5068_v12 = vadd.f32 %v1846_v63, %v1538_v25  ;;  %3815 = vmatmul.msk.f32.gmra.mxu2 %vm266_vm1, %v3781_v60  ;;  %v3783_v60 = vld [vmem:[%s4177_s11 + $0x108] sm:$0xff] }
 0x1dd   : > { %3881 = vmatmul.msk.f32.gmra.mxu3 %vm266_vm1, %v4651_v10 }
 0x1de   : > { %3947 = vmatmul.msk.f32.gmra.mxu0 %vm266_vm1, %v4682_v3 }
 0x1df   : > { %v2438_v52 = vpop.f32.mrf.mxu2 }
 0x1e0   : > { %v2534_v17 = vadd.f32 %v2438_v52, %v2191_v51  ;;  %v2780_v41 = vpop.f32.mrf.mxu3  ;;  %v2098_v11 = vpop.f32.mrf.mxu1 }
 0x1e1   : > { %v2192_v31 = vadd.f32 %v2098_v11, %v5441_v0 }
 0x1e2   : > { %v2876_v21 = vadd.f32 %v2780_v41, %v2534_v17 }
 0x1e3   : > { %v3125_v10 = vpop.f32.mrf.mxu0  ;;  %3750 = vmatmul.msk.f32.gmra.mxu1 %vm266_vm1, %v4665_v61 }
 0x1e4   : > { %v3218_v63 = vadd.f32 %v3122_v2, %v2876_v21  ;;  %3816 = vmatmul.msk.f32.gmra.mxu2 %vm266_vm1, %v3782_v56 }
 0x1e5   : > { %3882 = vmatmul.msk.f32.gmra.mxu3 %vm266_vm1, %v4668_v46 }
 0x1e6   : > { %3948 = vmatmul.msk.f32.gmra.mxu0 %vm266_vm1, %v4699_v13  ;;  %v3318_v35 = vadd.f32 %v5085_v62, %v3218_v63 }
 0x1e7   : > { %v2441_v43 = vpop.f32.mrf.mxu2 }
 0x1e8   : > { %3350 = vst [vmem:[%s5096_s6] sm:$0xff] %v3318_v35  ;;  %v2535_v47 = vadd.f32 %v2441_v43, %v2192_v31  ;;  %v2783_v61 = vpop.f32.mrf.mxu3  ;;  %v2101_v42 = vpop.f32.mrf.mxu1 }
 0x1e9   : > { %v2193_v51 = vadd.f32 %v2101_v42, %v5442_v28 }
 0x1ea   : > { %v2877_v25 = vadd.f32 %v2783_v61, %v2535_v47 }
 0x1eb   : > { %v3128_v46 = vpop.f32.mrf.mxu0  ;;  %3751 = vmatmul.msk.f32.gmra.mxu1 %vm266_vm1, %v4682_v3  ;;  %v3784_v3 = vld [vmem:[%s4177_s11 + $0x110] sm:$0xff] }
 0x1ec   : > { %v3219_v2 = vadd.f32 %v3125_v10, %v2877_v25  ;;  %3817 = vmatmul.msk.f32.gmra.mxu2 %vm266_vm1, %v3783_v60 }
 0x1ed   : > { %3883 = vmatmul.msk.f32.gmra.mxu3 %vm266_vm1, %v4685_v4  ;;  %v5443_v4 = vld [vmem:[#allocation37_spill] sm:$0xff] }
 0x1ee   : > { %3949 = vmatmul.msk.f32.gmra.mxu0 %vm266_vm1, %v4716_v27  ;;  %v3319_v52 = vadd.f32 %v5085_v62, %v3219_v2 }
 0x1ef   : > { %v2444_v17 = vpop.f32.mrf.mxu2 }
 0x1f0   : > { %3351 = vst [vmem:[%s5096_s6 + $0x8] sm:$0xff] %v3319_v52  ;;  %v2536_v41 = vadd.f32 %v2444_v17, %v2193_v51  ;;  %v2786_v11 = vpop.f32.mrf.mxu3  ;;  %v2104_v56 = vpop.f32.mrf.mxu1 }
 0x1f1   : > { %v2194_v0 = vadd.f32 %v2104_v56, %v5443_v4 }
 0x1f2   : > { %v2878_v21 = vadd.f32 %v2786_v11, %v2536_v41 }
 0x1f3   : > { %v3131_v10 = vpop.f32.mrf.mxu0  ;;  %3752 = vmatmul.msk.f32.gmra.mxu1 %vm266_vm1, %v4699_v13  ;;  %v3785_v13 = vld [vmem:[%s4177_s11 + $0x120] sm:$0xff] }
 0x1f4   : > { %v3220_v63 = vadd.f32 %v3128_v46, %v2878_v21  ;;  %3818 = vmatmul.msk.f32.gmra.mxu2 %vm266_vm1, %v3784_v3 }
 0x1f5   : > { %3884 = vmatmul.msk.f32.gmra.mxu3 %vm266_vm1, %v4702_v33  ;;  %v5444_v33 = vld [vmem:[#allocation38_spill] sm:$0xff] }
 0x1f6   : > { %3950 = vmatmul.msk.f32.gmra.mxu0 %vm266_vm1, %v4733_v44  ;;  %v3320_v31 = vadd.f32 %v5085_v62, %v3220_v63 }
 0x1f7   : > { %v2447_v35 = vpop.f32.mrf.mxu2 }
 0x1f8   : > { %3352 = vst [vmem:[%s5096_s6 + $0x10] sm:$0xff] %v3320_v31  ;;  %v2537_v43 = vadd.f32 %v2447_v35, %v2194_v0  ;;  %v2789_v47 = vpop.f32.mrf.mxu3  ;;  %v2107_v61 = vpop.f32.mrf.mxu1 }
 0x1f9   : > { %v2195_v46 = vadd.f32 %v2107_v61, %v5444_v33 }
 0x1fa   : > { %v2879_v42 = vadd.f32 %v2789_v47, %v2537_v43 }
 0x1fb   : > { %v3134_v60 = vpop.f32.mrf.mxu0  ;;  %3753 = vmatmul.msk.f32.gmra.mxu1 %vm266_vm1, %v4716_v27  ;;  %v3786_v27 = vld [vmem:[%s4177_s11 + $0x128] sm:$0xff] }
 0x1fc   : > { %v3221_v25 = vadd.f32 %v3131_v10, %v2879_v42  ;;  %3819 = vmatmul.msk.f32.gmra.mxu2 %vm266_vm1, %v3785_v13 }
 0x1fd   : > { %3885 = vmatmul.msk.f32.gmra.mxu3 %vm266_vm1, %v4719_v58  ;;  %v5445_v58 = vld [vmem:[#allocation39_spill] sm:$0xff] }
 0x1fe   : > { %3951 = vmatmul.msk.f32.gmra.mxu0 %vm266_vm1, %v4750_v8  ;;  %v3321_v2 = vadd.f32 %v5085_v62, %v3221_v25 }
 0x1ff   : > { %v2450_v28 = vpop.f32.mrf.mxu2 }
 0x200   : > { %3353 = vst [vmem:[%s5096_s6 + $0x18] sm:$0xff] %v3321_v2  ;;  %v2538_v51 = vadd.f32 %v2450_v28, %v2195_v46  ;;  %v2792_v52 = vpop.f32.mrf.mxu3  ;;  %v2110_v17 = vpop.f32.mrf.mxu1 }
 0x201   : > { %v2196_v3 = vadd.f32 %v2110_v17, %v5445_v58 }
 0x202   : > { %v2880_v41 = vadd.f32 %v2792_v52, %v2538_v51 }
 0x203   : > { %v3137_v11 = vpop.f32.mrf.mxu0  ;;  %3754 = vmatmul.msk.f32.gmra.mxu1 %vm266_vm1, %v4733_v44  ;;  %v3787_v44 = vld [vmem:[%s4177_s11 + $0x138] sm:$0xff] }
 0x204   : > { %v3222_v56 = vadd.f32 %v3134_v60, %v2880_v41  ;;  %3820 = vmatmul.msk.f32.gmra.mxu2 %vm266_vm1, %v3786_v27 }
 0x205   : > { %3886 = vmatmul.msk.f32.gmra.mxu3 %vm266_vm1, %v4736_v26  ;;  %v5446_v26 = vld [vmem:[#allocation40_spill] sm:$0xff] }
 0x206   : > { %3952 = vmatmul.msk.f32.gmra.mxu0 %vm266_vm1, %v4767_v32  ;;  %v3322_v21 = vadd.f32 %v5085_v62, %v3222_v56 }
 0x207   : > { %v2453_v10 = vpop.f32.mrf.mxu2 }
 0x208   : > { %3354 = vst [vmem:[%s5096_s6 + $0x20] sm:$0xff] %v3322_v21  ;;  %v2539_v63 = vadd.f32 %v2453_v10, %v2196_v3  ;;  %v2795_v4 = vpop.f32.mrf.mxu3  ;;  %v2113_v0 = vpop.f32.mrf.mxu1 }
 0x209   : > { %v2197_v47 = vadd.f32 %v2113_v0, %v5446_v26 }
 0x20a   : > { %v2881_v31 = vadd.f32 %v2795_v4, %v2539_v63 }
 0x20b   : > { %v3140_v35 = vpop.f32.mrf.mxu0  ;;  %3755 = vmatmul.msk.f32.gmra.mxu1 %vm266_vm1, %v4750_v8  ;;  %v3788_v8 = vld [vmem:[%s4177_s11 + $0x140] sm:$0xff] }
 0x20c   : > { %v3223_v43 = vadd.f32 %v3137_v11, %v2881_v31  ;;  %3821 = vmatmul.msk.f32.gmra.mxu2 %vm266_vm1, %v3787_v44 }
 0x20d   : > { %3887 = vmatmul.msk.f32.gmra.mxu3 %vm266_vm1, %v4753_v6  ;;  %v5447_v6 = vld [vmem:[#allocation41_spill] sm:$0xff] }
 0x20e   : > { %3953 = vmatmul.msk.f32.gmra.mxu0 %vm266_vm1, %v4784_v45  ;;  %v3323_v61 = vadd.f32 %v5085_v62, %v3223_v43 }
 0x20f   : > { %v2456_v13 = vpop.f32.mrf.mxu2 }
 0x210   : > { %3355 = vst [vmem:[%s5096_s6 + $0x28] sm:$0xff] %v3323_v61  ;;  %v2540_v42 = vadd.f32 %v2456_v13, %v2197_v47  ;;  %v2798_v60 = vpop.f32.mrf.mxu3  ;;  %v2116_v25 = vpop.f32.mrf.mxu1 }
 0x211   : > { %v2198_v28 = vadd.f32 %v2116_v25, %v5447_v6 }
 0x212   : > { %v2882_v33 = vadd.f32 %v2798_v60, %v2540_v42 }
 0x213   : > { %v3143_v46 = vpop.f32.mrf.mxu0  ;;  %3756 = vmatmul.msk.f32.gmra.mxu1 %vm266_vm1, %v4767_v32  ;;  %v3789_v32 = vld [vmem:[%s4177_s11 + $0x150] sm:$0xff] }
 0x214   : > { %v3224_v2 = vadd.f32 %v3140_v35, %v2882_v33  ;;  %3822 = vmatmul.msk.f32.gmra.mxu2 %vm266_vm1, %v3788_v8  ;;  %v5451_v33 = vld [vmem:[#allocation48_spill] sm:$0xff] }
 0x215   : > { %3888 = vmatmul.msk.f32.gmra.mxu3 %vm266_vm1, %v4770_v16  ;;  %v5448_v16 = vld [vmem:[#allocation42_spill] sm:$0xff] }
 0x216   : > { %3954 = vmatmul.msk.f32.gmra.mxu0 %vm266_vm1, %v4801_v59  ;;  %v3324_v51 = vadd.f32 %v5085_v62, %v3224_v2 }
 0x217   : > { %v2459_v52 = vpop.f32.mrf.mxu2 }
 0x218   : > { %3356 = vst [vmem:[%s5096_s6 + $0x30] sm:$0xff] %v3324_v51  ;;  %v2541_v17 = vadd.f32 %v2459_v52, %v2198_v28  ;;  %v2801_v27 = vpop.f32.mrf.mxu3  ;;  %v2119_v41 = vpop.f32.mrf.mxu1 }
 0x219   : > { %v2199_v3 = vadd.f32 %v2119_v41, %v5448_v16 }
 0x21a   : > { %v2883_v11 = vadd.f32 %v2801_v27, %v2541_v17  ;;  %v3792_v27 = vld [vmem:[%s4177_s11 + $0x170] sm:$0xff] }
 0x21b   : > { %v3146_v56 = vpop.f32.mrf.mxu0  ;;  %3757 = vmatmul.msk.f32.gmra.mxu1 %vm266_vm1, %v4784_v45  ;;  %v3790_v45 = vld [vmem:[%s4177_s11 + $0x158] sm:$0xff] }
 0x21c   : > { %v3225_v58 = vadd.f32 %v3143_v46, %v2883_v11  ;;  %3823 = vmatmul.msk.f32.gmra.mxu2 %vm266_vm1, %v3789_v32  ;;  %v5452_v46 = vld [vmem:[#allocation44_spill] sm:$0xff]  ;;  %v5453_v11 = vld [vmem:[#allocation46_spill] sm:$0xff] }
 0x21d   : > { %3889 = vmatmul.msk.f32.gmra.mxu3 %vm266_vm1, %v4787_v14  ;;  %v5449_v14 = vld [vmem:[#allocation43_spill] sm:$0xff] }
 0x21e   : > { %3955 = vmatmul.msk.f32.gmra.mxu0 %vm266_vm1, %v4818_v1  ;;  %v3325_v21 = vadd.f32 %v5085_v62, %v3225_v58 }
 0x21f   : > { %v2462_v10 = vpop.f32.mrf.mxu2 }
 0x220   : > { %3357 = vst [vmem:[%s5096_s6 + $0x38] sm:$0xff] %v3325_v21  ;;  %v2542_v63 = vadd.f32 %v2462_v10, %v2199_v3  ;;  %v2804_v4 = vpop.f32.mrf.mxu3  ;;  %v2122_v0 = vpop.f32.mrf.mxu1 }
 0x221   : > { %v2200_v43 = vadd.f32 %v2122_v0, %v5449_v14 }
 0x222   : > { %v2884_v44 = vadd.f32 %v2804_v4, %v2542_v63  ;;  %v3925_v4 = vld [vmem:[%s4177_s11 + $0x182] sm:$0xff] }
 0x223   : > { %v3149_v31 = vpop.f32.mrf.mxu0  ;;  %3758 = vmatmul.msk.f32.gmra.mxu1 %vm266_vm1, %v4801_v59  ;;  %v3791_v59 = vld [vmem:[%s4177_s11 + $0x168] sm:$0xff] }
 0x224   : > { %v3226_v35 = vadd.f32 %v3146_v56, %v2884_v44  ;;  %3824 = vmatmul.msk.f32.gmra.mxu2 %vm266_vm1, %v3790_v45 }
 0x225   : > { %3890 = vmatmul.msk.f32.gmra.mxu3 %vm266_vm1, %v4804_v18  ;;  %v5450_v18 = vld [vmem:[#allocation45_spill] sm:$0xff] }
 0x226   : > { %3956 = vmatmul.msk.f32.gmra.mxu0 %vm266_vm1, %v4835_v9  ;;  %v3326_v26 = vadd.f32 %v5085_v62, %v3226_v35 }
 0x227   : > { %v2465_v47 = vpop.f32.mrf.mxu2 }
 0x228   : > { %3358 = vst [vmem:[%s5096_s6 + $0x40] sm:$0xff] %v3326_v26  ;;  %v2543_v61 = vadd.f32 %v2465_v47, %v2200_v43  ;;  %v2807_v13 = vpop.f32.mrf.mxu3  ;;  %v2125_v42 = vpop.f32.mrf.mxu1 }
 0x229   : > { %v2201_v2 = vadd.f32 %v2125_v42, %v5452_v46  ;;  %v3927_v46 = vld [vmem:[%s4177_s11 + $0x19a] sm:$0xff] }
 0x22a   : > { %v2885_v60 = vadd.f32 %v2807_v13, %v2543_v61 }
 0x22b   : > { %v3152_v25 = vpop.f32.mrf.mxu0  ;;  %3759 = vmatmul.msk.f32.gmra.mxu1 %vm266_vm1, %v4818_v1 }
 0x22c   : > { %v3227_v8 = vadd.f32 %v3149_v31, %v2885_v60  ;;  %3825 = vmatmul.msk.f32.gmra.mxu2 %vm266_vm1, %v3791_v59 }
 0x22d   : > { %3891 = vmatmul.msk.f32.gmra.mxu3 %vm266_vm1, %v5450_v18  ;;  %v3795_v18 = vld [vmem:[%s4177_s11 + $0x198] sm:$0xff] }
 0x22e   : > { %3957 = vmatmul.msk.f32.gmra.mxu0 %vm266_vm1, %v5451_v33  ;;  %v3327_v6 = vadd.f32 %v5085_v62, %v3227_v8 }
 0x22f   : > { %v2468_v28 = vpop.f32.mrf.mxu2 }
 0x230   : > { %3359 = vst [vmem:[%s5096_s6 + $0x48] sm:$0xff] %v3327_v6  ;;  %v2544_v51 = vadd.f32 %v2468_v28, %v2201_v2  ;;  %v2810_v52 = vpop.f32.mrf.mxu3  ;;  %v2128_v17 = vpop.f32.mrf.mxu1 }
 0x231   : > { %v2202_v56 = vadd.f32 %v2128_v17, %v5453_v11  ;;  %v3928_v11 = vld [vmem:[%s4177_s11 + $0x1a2] sm:$0xff] }
 0x232   : > { %v2886_v1 = vadd.f32 %v2810_v52, %v2544_v51 }
 0x233   : > { %v3155_v41 = vpop.f32.mrf.mxu0  ;;  %3760 = vmatmul.msk.f32.gmra.mxu1 %vm266_vm1, %v4835_v9 }
 0x234   : > { %v3228_v32 = vadd.f32 %v3152_v25, %v2886_v1  ;;  %3826 = vmatmul.msk.f32.gmra.mxu2 %vm266_vm1, %v3792_v27  ;;  %v3796_v27 = vld [vmem:[%s4177_s11 + $0x1a0] sm:$0xff] }
 0x235   : > { %3892 = vmatmul.msk.f32.gmra.mxu3 %vm266_vm1, %v4838_v29  ;;  %v5454_v29 = vld [vmem:[#allocation47_spill] sm:$0xff] }
 0x236   : > { %3958 = vmatmul.msk.f32.gmra.mxu0 %vm266_vm1, %v4872_v19  ;;  %v3328_v58 = vadd.f32 %v5085_v62, %v3228_v32 }
 0x237   : > { %v2471_v16 = vpop.f32.mrf.mxu2 }
 0x238   : > { %3360 = vst [vmem:[%s5096_s6 + $0x50] sm:$0xff] %v3328_v58  ;;  %v2545_v3 = vadd.f32 %v2471_v16, %v2202_v56  ;;  %v2813_v21 = vpop.f32.mrf.mxu3  ;;  %v2131_v10 = vpop.f32.mrf.mxu1 }
 0x239   : > { %v2203_v45 = vadd.f32 %v2131_v10, %v5454_v29 }
 0x23a   : > { %v2887_v63 = vadd.f32 %v2813_v21, %v2545_v3 }
 0x23b   : > { %v3158_v9 = vpop.f32.mrf.mxu0  ;;  %3761 = vmatmul.msk.f32.gmra.mxu1 %vm266_vm1, %v5451_v33  ;;  %v3861_v33 = vld [vmem:[%s4177_s11 + $0x199] sm:$0xff] }
 0x23c   : > { %v3229_v0 = vadd.f32 %v3155_v41, %v2887_v63  ;;  %3827 = vmatmul.msk.f32.gmra.mxu2 %vm266_vm1, %v4855_v23  ;;  %v3926_v23 = vld [vmem:[%s4177_s11 + $0x18a] sm:$0xff]  ;;  %v3862_v41 = vld [vmem:[%s4177_s11 + $0x1a1] sm:$0xff]  ;;  %s3395_s11 = sshll.u32 %s5096_s6, 4  ;;  %s3396_s11 = int_to_ptr.vmem [resolvable:$true] %s3395_s11 }
 0x23d   : > { %3893 = vmatmul.msk.f32.gmra.mxu3 %vm266_vm1, %v4858_v37  ;;  %v5455_v37 = vld [vmem:[#allocation49_spill] sm:$0xff] }
 0x23e   : > { %3959 = vmatmul.msk.f32.gmra.mxu0 %vm266_vm1, %v3925_v4  ;;  %v3329_v44 = vadd.f32 %v5085_v62, %v3229_v0 }
 0x23f   : > { %v2474_v31 = vpop.f32.mrf.mxu2 }
 0x240   : > { %3361 = vst [vmem:[%s5096_s6 + $0x58] sm:$0xff] %v3329_v44  ;;  %v2546_v35 = vadd.f32 %v2474_v31, %v2203_v45  ;;  %v2816_v14 = vpop.f32.mrf.mxu3  ;;  %v2134_v43 = vpop.f32.mrf.mxu1 }
 0x241   : > { %v2204_v13 = vadd.f32 %v2134_v43, %v5455_v37 }
 0x242   : > { %v2888_v26 = vadd.f32 %v2816_v14, %v2546_v35 }
 0x243   : > { %v3161_v47 = vpop.f32.mrf.mxu0  ;;  %3762 = vmatmul.msk.f32.gmra.mxu1 %vm266_vm1, %v4872_v19 }
 0x244   : > { %v3230_v61 = vadd.f32 %v3158_v9, %v2888_v26  ;;  %3828 = vmatmul.msk.f32.gmra.mxu2 %vm266_vm1, %v4875_v38 }
 0x245   : > { %3894 = vmatmul.msk.f32.gmra.mxu3 %vm266_vm1, %v4878_v22 }
 0x246   : > { %3960 = vmatmul.msk.f32.gmra.mxu0 %vm266_vm1, %v3926_v23  ;;  %v3330_v42 = vadd.f32 %v5085_v62, %v3230_v61 }
 0x247   : > { %v2477_v59 = vpop.f32.mrf.mxu2 }
 0x248   : > { %3362 = vst [vmem:[%s5096_s6 + $0x60] sm:$0xff] %v3330_v42  ;;  %v2547_v60 = vadd.f32 %v2477_v59, %v2204_v13  ;;  %v2819_v25 = vpop.f32.mrf.mxu3  ;;  %v2137_v8 = vpop.f32.mrf.mxu1 }
 0x249   : > { %v2205_v2 = vadd.f32 %v2137_v8, %v4880_v15 }
 0x24a   : > { %v2889_v19 = vadd.f32 %v2819_v25, %v2547_v60 }
 0x24b   : > { %v3164_v38 = vpop.f32.mrf.mxu0  ;;  %3763 = vmatmul.msk.f32.gmra.mxu1 %vm266_vm1, %v3925_v4 }
 0x24c   : > { %v3231_v22 = vadd.f32 %v3161_v47, %v2889_v19  ;;  %3829 = vmatmul.msk.f32.gmra.mxu2 %vm266_vm1, %v3795_v18 }
 0x24d   : > { %3895 = vmatmul.msk.f32.gmra.mxu3 %vm266_vm1, %v3861_v33 }
 0x24e   : > { %3961 = vmatmul.msk.f32.gmra.mxu0 %vm266_vm1, %v3927_v46  ;;  %v3331_v6 = vadd.f32 %v5085_v62, %v3231_v22 }
 0x24f   : > { %v2480_v28 = vpop.f32.mrf.mxu2 }
 0x250   : > { %3363 = vst [vmem:[%s5096_s6 + $0x68] sm:$0xff] %v3331_v6  ;;  %v2548_v51 = vadd.f32 %v2480_v28, %v2205_v2  ;;  %v2822_v52 = vpop.f32.mrf.mxu3  ;;  %v2140_v17 = vpop.f32.mrf.mxu1 }
 0x251   : > { %v2206_v15 = vadd.f32 %v2140_v17, %v4891_v30 }
 0x252   : > { %v2890_v1 = vadd.f32 %v2822_v52, %v2548_v51 }
 0x253   : > { %v3167_v32 = vpop.f32.mrf.mxu0  ;;  %3764 = vmatmul.msk.f32.gmra.mxu1 %vm266_vm1, %v3926_v23 }
 0x254   : > { %v3232_v56 = vadd.f32 %v3164_v38, %v2890_v1  ;;  %3830 = vmatmul.msk.f32.gmra.mxu2 %vm266_vm1, %v3796_v27 }
 0x255   : > { %3896 = vmatmul.msk.f32.gmra.mxu3 %vm266_vm1, %v3862_v41 }
 0x256   : > { %3962 = vmatmul.msk.f32.gmra.mxu0 %vm266_vm1, %v3928_v11  ;;  %v3332_v58 = vadd.f32 %v5085_v62, %v3232_v56 }
 0x257   : > { %v2483_v16 = vpop.f32.mrf.mxu2 }
 0x258   : > { %3364 = vst [vmem:[%s5096_s6 + $0x70] sm:$0xff] %v3332_v58  ;;  %v2549_v3 = vadd.f32 %v2483_v16, %v2206_v15  ;;  %v2825_v21 = vpop.f32.mrf.mxu3  ;;  %v2143_v10 = vpop.f32.mrf.mxu1 }
 0x259   : > { %v2207_v0 = vadd.f32 %v2143_v10, %v4902_v34 }
 0x25a   : > { %v2891_v63 = vadd.f32 %v2825_v21, %v2549_v3 }
 0x25b   : > { %v3170_v9 = vpop.f32.mrf.mxu0 }
 0x25c   : > { %v3233_v4 = vadd.f32 %v3167_v32, %v2891_v63 }
 0x25e   : > { %v3333_v29 = vadd.f32 %v5085_v62, %v3233_v4 }
 0x25f   : > { %v2486_v45 = vpop.f32.mrf.mxu2 }
 0x260   : > { %3365 = vst [vmem:[%s5096_s6 + $0x78] sm:$0xff] %v3333_v29  ;;  %v2550_v44 = vadd.f32 %v2486_v45, %v2207_v0  ;;  %v2828_v31 = vpop.f32.mrf.mxu3  ;;  %v2146_v30 = vpop.f32.mrf.mxu1 }
 0x261   : > { %v2208_v26 = vadd.f32 %v2146_v30, %v4913_v7 }
 0x262   : > { %v2892_v35 = vadd.f32 %v2828_v31, %v2550_v44 }
 0x263   : > { %v3173_v14 = vpop.f32.mrf.mxu0 }
 0x264   : > { %v3234_v43 = vadd.f32 %v3170_v9, %v2892_v35 }
 0x266   : > { %v3334_v47 = vadd.f32 %v5085_v62, %v3234_v43 }
 0x267   : > { %v2489_v23 = vpop.f32.mrf.mxu2 }
 0x268   : > { %3366 = vst [vmem:[%s5096_s6 + $0x80] sm:$0xff] %v3334_v47  ;;  %v2551_v61 = vadd.f32 %v2489_v23, %v2208_v26  ;;  %v2831_v37 = vpop.f32.mrf.mxu3  ;;  %v2149_v34 = vpop.f32.mrf.mxu1 }
 0x269   : > { %v2209_v60 = vadd.f32 %v2149_v34, %v4924_v39 }
 0x26a   : > { %v2893_v13 = vadd.f32 %v2831_v37, %v2551_v61 }
 0x26b   : > { %v3176_v42 = vpop.f32.mrf.mxu0 }
 0x26c   : > { %v3235_v59 = vadd.f32 %v3173_v14, %v2893_v13 }
 0x26e   : > { %v3335_v25 = vadd.f32 %v5085_v62, %v3235_v59 }
 0x26f   : > { %v2492_v8 = vpop.f32.mrf.mxu2 }
 0x270   : > { %3367 = vst [vmem:[%s5096_s6 + $0x88] sm:$0xff] %v3335_v25  ;;  %v2552_v18 = vadd.f32 %v2492_v8, %v2209_v60  ;;  %v2834_v19 = vpop.f32.mrf.mxu3  ;;  %v2152_v7 = vpop.f32.mrf.mxu1 }
 0x271   : > { %v2210_v22 = vadd.f32 %v2152_v7, %v4936_v53 }
 0x272   : > { %v2894_v33 = vadd.f32 %v2834_v19, %v2552_v18 }
 0x273   : > { %v3179_v38 = vpop.f32.mrf.mxu0 }
 0x274   : > { %v3236_v46 = vadd.f32 %v3176_v42, %v2894_v33 }
 0x276   : > { %v3336_v2 = vadd.f32 %v5085_v62, %v3236_v46 }
 0x277   : > { %v2495_v6 = vpop.f32.mrf.mxu2 }
 0x278   : > { %3368 = vst [vmem:[%s5096_s6 + $0x90] sm:$0xff] %v3336_v2  ;;  %v2553_v28 = vadd.f32 %v2495_v6, %v2210_v22  ;;  %v2837_v51 = vpop.f32.mrf.mxu3  ;;  %v2155_v39 = vpop.f32.mrf.mxu1 }
 0x279   : > { %v2211_v1 = vadd.f32 %v2155_v39, %v4947_v50 }
 0x27a   : > { %v2895_v52 = vadd.f32 %v2837_v51, %v2553_v28 }
 0x27b   : > { %v3182_v17 = vpop.f32.mrf.mxu0 }
 0x27c   : > { %v3237_v27 = vadd.f32 %v3179_v38, %v2895_v52 }
 0x27e   : > { %v3337_v41 = vadd.f32 %v5085_v62, %v3237_v27 }
 0x27f   : > { %v2498_v32 = vpop.f32.mrf.mxu2 }
 0x280   : > { %3369 = vst [vmem:[%s5096_s6 + $0x98] sm:$0xff] %v3337_v41  ;;  %v2554_v11 = vadd.f32 %v2498_v32, %v2211_v1  ;;  %v2840_v56 = vpop.f32.mrf.mxu3  ;;  %v2158_v53 = vpop.f32.mrf.mxu1 }
 0x281   : > { %v2212_v3 = vadd.f32 %v2158_v53, %v4958_v24 }
 0x282   : > { %v2896_v15 = vadd.f32 %v2840_v56, %v2554_v11 }
 0x283   : > { %v3185_v58 = vpop.f32.mrf.mxu0 }
 0x284   : > { %v3238_v16 = vadd.f32 %v3182_v17, %v2896_v15 }
 0x286   : > { %v3338_v21 = vadd.f32 %v5085_v62, %v3238_v16 }
 0x287   : > { %v2501_v10 = vpop.f32.mrf.mxu2 }
 0x288   : > { %3370 = vst [vmem:[%s5096_s6 + $0xa0] sm:$0xff] %v3338_v21  ;;  %v2555_v63 = vadd.f32 %v2501_v10, %v2212_v3  ;;  %v2843_v9 = vpop.f32.mrf.mxu3  ;;  %v2161_v50 = vpop.f32.mrf.mxu1 }
 0x289   : > { %v2213_v45 = vadd.f32 %v2161_v50, %v4969_v49 }
 0x28a   : > { %v2897_v4 = vadd.f32 %v2843_v9, %v2555_v63 }
 0x28b   : > { %v3188_v0 = vpop.f32.mrf.mxu0 }
 0x28c   : > { %v3239_v29 = vadd.f32 %v3185_v58, %v2897_v4 }
 0x28e   : > { %v3339_v44 = vadd.f32 %v5085_v62, %v3239_v29 }
 0x28f   : > { %v2504_v31 = vpop.f32.mrf.mxu2 }
 0x290   : > { %3371 = vst [vmem:[%s5096_s6 + $0xa8] sm:$0xff] %v3339_v44  ;;  %v2556_v30 = vadd.f32 %v2504_v31, %v2213_v45  ;;  %v2846_v35 = vpop.f32.mrf.mxu3  ;;  %v2164_v24 = vpop.f32.mrf.mxu1 }
 0x291   : > { %v2214_v47 = vadd.f32 %v2164_v24, %v4980_v57 }
 0x292   : > { %v2898_v14 = vadd.f32 %v2846_v35, %v2556_v30 }
 0x293   : > { %v3191_v43 = vpop.f32.mrf.mxu0 }
 0x294   : > { %v3240_v26 = vadd.f32 %v3188_v0, %v2898_v14 }
 0x296   : > { %v3340_v23 = vadd.f32 %v5085_v62, %v3240_v26 }
 0x297   : > { %v2507_v61 = vpop.f32.mrf.mxu2 }
 0x298   : > { %3372 = vst [vmem:[%s5096_s6 + $0xb0] sm:$0xff] %v3340_v23  ;;  %v2557_v37 = vadd.f32 %v2507_v61, %v2214_v47  ;;  %v2849_v34 = vpop.f32.mrf.mxu3  ;;  %v2167_v49 = vpop.f32.mrf.mxu1 }
 0x299   : > { %v2215_v60 = vadd.f32 %v2167_v49, %v4991_v5 }
 0x29a   : > { %v2899_v13 = vadd.f32 %v2849_v34, %v2557_v37 }
 0x29b   : > { %v3194_v42 = vpop.f32.mrf.mxu0 }
 0x29c   : > { %v3241_v59 = vadd.f32 %v3191_v43, %v2899_v13 }
 0x29e   : > { %v3341_v25 = vadd.f32 %v5085_v62, %v3241_v59 }
 0x29f   : > { %v2510_v8 = vpop.f32.mrf.mxu2 }
 0x2a0   : > { %3373 = vst [vmem:[%s5096_s6 + $0xb8] sm:$0xff] %v3341_v25  ;;  %v2558_v18 = vadd.f32 %v2510_v8, %v2215_v60  ;;  %v2852_v19 = vpop.f32.mrf.mxu3  ;;  %v2170_v57 = vpop.f32.mrf.mxu1 }
 0x2a1   : > { %v2216_v46 = vadd.f32 %v2170_v57, %v5002_v54 }
 0x2a2   : > { %v2900_v7 = vadd.f32 %v2852_v19, %v2558_v18 }
 0x2a3   : > { %v3197_v33 = vpop.f32.mrf.mxu0 }
 0x2a4   : > { %v3242_v38 = vadd.f32 %v3194_v42, %v2900_v7 }
 0x2a6   : > { %v3342_v22 = vadd.f32 %v5085_v62, %v3242_v38 }
 0x2a7   : > { %v2513_v2 = vpop.f32.mrf.mxu2 }
 0x2a8   : > { %3374 = vst [vmem:[%s5096_s6 + $0xc0] sm:$0xff] %v3342_v22  ;;  %v2559_v6 = vadd.f32 %v2513_v2, %v2216_v46  ;;  %v2855_v28 = vpop.f32.mrf.mxu3  ;;  %v2173_v5 = vpop.f32.mrf.mxu1 }
 0x2a9   : > { %v2217_v17 = vadd.f32 %v2173_v5, %v5013_v36 }
 0x2aa   : > { %v2901_v51 = vadd.f32 %v2855_v28, %v2559_v6 }
 0x2ab   : > { %v3200_v39 = vpop.f32.mrf.mxu0 }
 0x2ac   : > { %v3243_v52 = vadd.f32 %v3197_v33, %v2901_v51 }
 0x2ae   : > { %v3343_v27 = vadd.f32 %v5085_v62, %v3243_v52 }
 0x2af   : > { %v2516_v1 = vpop.f32.mrf.mxu2 }
 0x2b0   : > { %3375 = vst [vmem:[%s5096_s6 + $0xc8] sm:$0xff] %v3343_v27  ;;  %v2560_v41 = vadd.f32 %v2516_v1, %v2217_v17  ;;  %v2858_v32 = vpop.f32.mrf.mxu3  ;;  %v2176_v54 = vpop.f32.mrf.mxu1 }
 0x2b1   : > { %v2218_v15 = vadd.f32 %v2176_v54, %v5024_v20 }
 0x2b2   : > { %v2902_v11 = vadd.f32 %v2858_v32, %v2560_v41 }
 0x2b3   : > { %v3203_v56 = vpop.f32.mrf.mxu0 }
 0x2b4   : > { %v3244_v53 = vadd.f32 %v3200_v39, %v2902_v11 }
 0x2b6   : > { %v3344_v58 = vadd.f32 %v5085_v62, %v3244_v53 }
 0x2b7   : > { %v2519_v16 = vpop.f32.mrf.mxu2 }
 0x2b8   : > { %3376 = vst [vmem:[%s5096_s6 + $0xd0] sm:$0xff] %v3344_v58  ;;  %v2561_v3 = vadd.f32 %v2519_v16, %v2218_v15  ;;  %v2861_v21 = vpop.f32.mrf.mxu3  ;;  %v2179_v36 = vpop.f32.mrf.mxu1 }
 0x2b9   : > { %v2219_v50 = vadd.f32 %v2179_v36, %v5035_v55 }
 0x2ba   : > { %v2903_v10 = vadd.f32 %v2861_v21, %v2561_v3 }
 0x2bb   : > { %v3206_v63 = vpop.f32.mrf.mxu0 }
 0x2bc   : > { %v3245_v9 = vadd.f32 %v3203_v56, %v2903_v10 }
 0x2be   : > { %v3345_v4 = vadd.f32 %v5085_v62, %v3245_v9 }
 0x2bf   : > { %v2522_v0 = vpop.f32.mrf.mxu2 }
 0x2c0   : > { %3377 = vst [vmem:[%s5096_s6 + $0xd8] sm:$0xff] %v3345_v4  ;;  %v2562_v29 = vadd.f32 %v2522_v0, %v2219_v50  ;;  %v2864_v45 = vpop.f32.mrf.mxu3  ;;  %v2182_v20 = vpop.f32.mrf.mxu1 }
 0x2c1   : > { %v2220_v35 = vadd.f32 %v2182_v20, %v5046_v48 }
 0x2c2   : > { %v2904_v44 = vadd.f32 %v2864_v45, %v2562_v29 }
 0x2c3   : > { %v3209_v30 = vpop.f32.mrf.mxu0 }
 0x2c4   : > { %v3246_v31 = vadd.f32 %v3206_v63, %v2904_v44 }
 0x2c6   : > { %v3346_v24 = vadd.f32 %v5085_v62, %v3246_v31 }
 0x2c7   : > { %v2525_v14 = vpop.f32.mrf.mxu2 }
 0x2c8   : > { %3378 = vst [vmem:[%s5096_s6 + $0xe0] sm:$0xff] %v3346_v24  ;;  %v2563_v43 = vadd.f32 %v2525_v14, %v2220_v35  ;;  %v2867_v55 = vpop.f32.mrf.mxu3  ;;  %v2185_v26 = vpop.f32.mrf.mxu1 }
 0x2c9   : > { %v2221_v61 = vadd.f32 %v2185_v26, %v5057_v40 }
 0x2ca   : > { %v2905_v47 = vadd.f32 %v2867_v55, %v2563_v43 }
 0x2cb   : > { %v3212_v49 = vpop.f32.mrf.mxu0 }
 0x2cc   : > { %v3247_v23 = vadd.f32 %v3209_v30, %v2905_v47 }
 0x2ce   : > { %v3347_v37 = vadd.f32 %v5085_v62, %v3247_v23 }
 0x2cf   : > { %v2528_v34 = vpop.f32.mrf.mxu2 }
 0x2d0   : > { %3379 = vst [vmem:[%s5096_s6 + $0xe8] sm:$0xff] %v3347_v37  ;;  %v2564_v48 = vadd.f32 %v2528_v34, %v2221_v61  ;;  %v2870_v13 = vpop.f32.mrf.mxu3  ;;  %v2188_v59 = vpop.f32.mrf.mxu1 }
 0x2d1   : > { %v2222_v25 = vadd.f32 %v2188_v59, %v5068_v12 }
 0x2d2   : > { %v2906_v42 = vadd.f32 %v2870_v13, %v2564_v48 }
 0x2d3   : > { %v3215_v57 = vpop.f32.mrf.mxu0 }
 0x2d4   : > { %v3248_v60 = vadd.f32 %v3212_v49, %v2906_v42 }
 0x2d6   : > { %v3348_v8 = vadd.f32 %v5085_v62, %v3248_v60 }
 0x2d7   : > { %v2531_v18 = vpop.f32.mrf.mxu2 }
 0x2d8   : > { %3380 = vst [vmem:[%s5096_s6 + $0xf0] sm:$0xff] %v3348_v8  ;;  %v2565_v40 = vadd.f32 %v2531_v18, %v2222_v25  ;;  %v2873_v19 = vpop.f32.mrf.mxu3 }
 0x2da   : > { %v2907_v7 = vadd.f32 %v2873_v19, %v2565_v40 }
 0x2dc   : > { %v3249_v33 = vadd.f32 %v3215_v57, %v2907_v7 }
 0x2de   : > { %v3349_v12 = vadd.f32 %v5085_v62, %v3249_v33 }
 0x2e0   : > { %3381 = vst [vmem:[%s5096_s6 + $0xf8] sm:$0xff] %v3349_v12 }
 0x2e1   : > { %4042 = shalt.err (!%p4039_p3)
}
 0x2e2   : > { %s4079_s29 = smov 128   ;;  %s4080_s30 = smov 8  }
 0x2e3   : > { %3973 = dma.vmem_to_hbm [thread:$0]  (%p4139_p5), %s3396_s11, 4096, %s3398_s17, %s3383_s16, %s4079_s29, %s4079_s29, %s4080_s30  }
 0x2e4 PF: > { %p3979_p4 = scmp.ge.s32.totalorder %s4077_s15, 2  ;;  %s3412_s4 = sand.u32 1, %s4065_s12  }
 0x2e5   : > { %s3413_s5 = scalar_lea.sflag [#allocation4], %s3412_s4 }
 0x2e6   : > { %p3976_p7 = pnand %p3979_p4, %p4143_p6 }
 0x2e8   : > { %p3977_p8 = pneg %p3976_p7 }
 0x2ea   : > { %4060 = dma.done.wait (%p3977_p8), %s3413_s5, 4096  }
 0x2eb   : > { %4062 = vsyncadd (%p3977_p8), %s3413_s5, 4294963200  ;;  %p13_p9 = scmp.ge.s32.totalorder %s4126_s18, 4   ;;  %s5456_s12 = smov %s4069_s13 }
 0x2ec   : > { %s5457_s13 = smov %s4073_s14  ;;  %s5458_s14 = smov %s4137_s21 }
 0x2ed   : > { %s5459_s15 = smov %s4126_s18  ;;  %15 = sbr.rel (!%p13_p9) target bundleno = 3 (0x3), region = 77 }
 0x2f2   :  { %3419 = vsyncpa [#allocation4], 1 }
 0x2f3   :  { %3421 = vsyncpa [#allocation4 + $0x1], 1 }

</bundles_post_ra>
